<compile_context>
chip_gen: v7x
topology: tpu7x:2x2x1
jax: 0.10.0
libtpu: 0.0.40
codegen_flags: <defaults>
</compile_context>

<pallas_src>
import functools

import jax
import jax.numpy as jnp
from jax.experimental import pallas as pl
from jax.experimental.pallas import tpu as pltpu

EMB_DIM = 32   # self.emb_dim
S2V_T = 3      # struc2vec message-passing iterations


def _round_up(x, m):
    return -(-x // m) * m


# --------------------------------------------------------------------------
# kernel
# --------------------------------------------------------------------------
def _valuenet_kernel(nfm_ref, wadj_ref, reach_ref,
                     w1_ref, b1_ref, w2_ref, b2_ref,
                     w6_ref, b6_ref, w7_ref, b7_ref,
                     w5g_ref, w5l_ref, b5_ref,
                     v_ref):
    f32 = jnp.float32
    nfm = nfm_ref[...]                 # (Bb, N, D)  caller dtype (f32 or bf16)
    wadj = wadj_ref[...]               # (Bb, N, N)
    reach = reach_ref[...]             # (Bb, N)

    Bb, N, D = nfm.shape
    w1 = w1_ref[...]; b1 = b1_ref[...]
    w2 = w2_ref[...]; b2 = b2_ref[...]
    w6 = w6_ref[...]; b6 = b6_ref[...]
    w7 = w7_ref[...]; b7 = b7_ref[...]
    w5g = w5g_ref[...].astype(f32)     # (1, E) global half of theta5_v1
    w5l = w5l_ref[...].astype(f32)     # (1, E) local  half of theta5_v1
    b5 = b5_ref[...].astype(f32)       # (1, 1)
    E = w1.shape[1]
    cdt = w1.dtype                     # MXU operand dtype (f32 exact / bf16 fast)

    # theta1 applied once, theta2 bias folded in; flattened GEMM for MXU occupancy.
    base = (jnp.dot(nfm.reshape(Bb * N, D).astype(cdt), w1,
                    preferred_element_type=f32)
            + (b1 + b2).astype(f32)).reshape(Bb, N, E)

    # Adjacency columns hoisted out of the S2V loop (wadj is iteration-invariant).
    w_cols = [wadj[:, :, j:j + 1].astype(f32) for j in range(N)]

    # ---- struc2vec: mu_{t+1} = relu(theta1(nfm) + theta2(W @ mu_t)) ----
    mu = jnp.maximum(base, 0.0)                      # first iteration (mu_0 = 0)
    for _ in range(S2V_T - 1):                       # static unroll
        # Re-associated: theta2 first (dense flattened MXU GEMM) ...
        h = jnp.dot(mu.reshape(Bb * N, E).astype(cdt), w2,
                    preferred_element_type=f32).reshape(Bb, N, E)
        # ... then W @ h as a VPU broadcast-FMA over the N source nodes
        # (per-batch 8x8x32 MXU matmuls were <1% MXU-utilized at small N).
        agg = w_cols[0] * h[:, 0:1, :]
        for j in range(1, N):
            agg = agg + w_cols[j] * h[:, j:j + 1, :]
        mu = jnp.maximum(base + agg, 0.0)

    # ---- value head ----
    g = jnp.sum(mu, axis=1)                                              # (Bb, E)
    glob = jnp.maximum(
        jnp.dot(g.astype(cdt), w6, preferred_element_type=f32)
        + b6.astype(f32), 0.0)                                           # (Bb, E)
    loc = jnp.maximum(
        jnp.dot(mu.reshape(Bb * N, E).astype(cdt), w7,
                preferred_element_type=f32) + b7.astype(f32), 0.0)       # (Bb*N, E)

    # theta5_v1(relu(cat([global, local]))) split into global / local halves.
    q_g = jnp.sum(glob * w5g, axis=-1)                                   # (Bb,)
    q_l = jnp.sum(loc.reshape(Bb, N, E) * w5l, axis=-1)                  # (Bb, N)
    q = q_l + q_g[:, None] + b5[0, 0]

    # qvals[~reachable] = -1e12 ; v = max over nodes.
    q = jnp.where(reach != 0.0, q, jnp.float32(-1.0e12))
    v = jnp.max(q, axis=-1)                                              # (Bb,)
    # TODO(synk): an (N, Bb) batch-on-lane tail (sublane max) would run the
    # mask/select at full lane width, but needs an in-kernel (Bb,N)->(N,Bb)
    # transpose; at N=8 the tail is ~1% of the work, so we keep the batch-major
    # q and the (already lane-dense) (1,1,Bb) output store.
    v_ref[...] = v[None, None, :]                                        # (1, 1, Bb)


# --------------------------------------------------------------------------
# wrapper
# --------------------------------------------------------------------------
def _const_spec(shape):
    nd = len(shape)
    return pl.BlockSpec(shape, lambda b: (0,) * nd)   # resident across grid steps


def _vmem_plan():
    """(vmem_limit_bytes, data_budget_bytes) for the current TPU generation."""
    try:
        phys = int(pltpu.get_tpu_info().vmem_capacity_bytes)
    except Exception:
        phys = 64 << 20                       # conservative (v7x per-TensorCore)
    limit = min(phys // 2, 64 << 20)          # ~64 MiB on v5e/v6e, ~32 MiB on v7x
    limit = max(limit, 32 << 20)
    budget = limit - (4 << 20)                # headroom for weights / compiler scratch
    return limit, budget


def _auto_b_blk(B, N, D, E, in_itemsize, budget, core_parallel):
    """Padding-aware (8-sublane / 128-lane) VMEM budget per batch element."""
    def slab(sub, lane, isz):
        return _round_up(sub, 8) * _round_up(lane, 128) * isz
    # double-buffered input blocks, per batch element
    in_elem = 2 * (slab(N, D, in_itemsize)             # nfm
                   + slab(N, N, in_itemsize)           # W (adjacency)
                   + _round_up(N, 128) * 4)            # reachable row
    # live f32 activation slabs per element (base, mu, h, agg, loc + slop)
    act_elem = 6 * slab(N, E, 4)
    bmax = max(8, budget // max(1, in_elem + act_elem))
    bmax = (bmax // 128) * 128 if bmax >= 128 else (bmax // 8) * 8
    num_blk = -(-B // min(bmax, _round_up(B, 8)))
    if core_parallel and B >= 16:
        num_blk = max(num_blk, 2)                      # v7x: >=1 block per TensorCore
    b = -(-B // num_blk)
    b = _round_up(b, 128) if b >= 128 else _round_up(b, 8)
    return int(b)


@functools.partial(jax.jit, static_argnums=(4, 5, 6, 7))
def _valuenet_call(nfm, wadj, reach, params, b_blk, vmem_limit,
                   use_bf16, core_parallel):
    B, N, D = nfm.shape
    E = params[0].shape[1]
    cdt = jnp.bfloat16 if use_bf16 else jnp.float32
    params = tuple(p.astype(cdt) for p in params)      # MXU weight operands

    num_blk = -(-B // b_blk)
    B_pad = num_blk * b_blk
    if B_pad != B:
        # padded batch rows have reach == 0 everywhere -> q == -1e12 (finite),
        # never touch real rows, and are sliced off below.
        pad = ((0, B_pad - B),)
        nfm = jnp.pad(nfm, pad + ((0, 0), (0, 0)))
        wadj = jnp.pad(wadj, pad + ((0, 0), (0, 0)))
        reach = jnp.pad(reach, pad + ((0, 0),))

    flops = B_pad * (2 * N * D * E
                     + (S2V_T - 1) * (2 * N * E * E + 2 * N * N * E)
                     + 2 * E * E + 2 * N * E * E + 6 * N * E)
    bytes_acc = (nfm.size * nfm.dtype.itemsize
                 + wadj.size * wadj.dtype.itemsize
                 + reach.size * reach.dtype.itemsize
                 + sum(p.size * p.dtype.itemsize for p in params)
                 + B_pad * 4)
    cost = pl.CostEstimate(flops=int(flops), transcendentals=0,
                           bytes_accessed=int(bytes_acc))

    grid_spec = pltpu.PrefetchScalarGridSpec(
        num_scalar_prefetch=0,
        grid=(num_blk,),
        in_specs=[pl.BlockSpec((b_blk, N, D), lambda b: (b, 0, 0)),   # nfm
                  pl.BlockSpec((b_blk, N, N), lambda b: (b, 0, 0)),   # W
                  pl.BlockSpec((b_blk, N),    lambda b: (b, 0))]      # reachable
                 + [_const_spec(p.shape) for p in params],            # resident weights
        out_specs=pl.BlockSpec((1, 1, b_blk), lambda b: (b, 0, 0)),   # batch on lanes
    )

    sem = pltpu.CORE_PARALLEL if core_parallel else pltpu.PARALLEL
    out = pl.pallas_call(
        _valuenet_kernel,
        out_shape=jax.ShapeDtypeStruct((num_blk, 1, b_blk), jnp.float32),
        grid_spec=grid_spec,
        compiler_params=pltpu.CompilerParams(
            dimension_semantics=(sem,),
            vmem_limit_bytes=int(vmem_limit)),
        cost_estimate=cost,
    )(nfm, wadj, reach, *params)

    return out.reshape(B_pad)[:B]


def stuc2vec_valuenet(nfm, wadj, reach, params, b_blk=None,
                      use_bf16=False, core_parallel=False):
    """v = max over reachable nodes of the value head (matches PyTorch forward)."""
    B, N, D = nfm.shape
    E = params[0].shape[1]
    vmem_limit, budget = _vmem_plan()
    if b_blk is None:
        b_blk = _auto_b_blk(B, N, D, E, nfm.dtype.itemsize, budget, core_parallel)
    b_blk = int(_round_up(max(8, int(b_blk)), 8))       # sublane-aligned batch blocks
    return _valuenet_call(nfm, wadj, reach, params,
                          b_blk, vmem_limit, bool(use_bf16), bool(core_parallel))


def stuc2vec_valuenet_packed(X, params, **kw):
    """Mirrors the PyTorch forward signature: X = cat([nfm, W, reachable], -1)."""
    if X.ndim == 2:                    # mirrors X.unsqueeze(0)
        X = X[None]
    N = X.shape[1]
    D = X.shape[2] - N - 1
    return stuc2vec_valuenet(X[:, :, :D], X[:, :, D:D + N], X[:, :, D + N],
                             params, **kw)


# --------------------------------------------------------------------------
# synthetic parameters (struc2vec weights + value-head weights)
# --------------------------------------------------------------------------
def make_params(key, node_dim, emb_dim):
    ks = jax.random.split(key, 11)

    def lin(k, fin, fout):
        return jax.random.normal(k, (fin, fout), jnp.float32) * 0.1

    w1 = lin(ks[0], node_dim, emb_dim)                               # struc2vec theta1
    b1 = jax.random.normal(ks[1], (1, emb_dim), jnp.float32) * 0.01
    w2 = lin(ks[2], emb_dim, emb_dim)                                # struc2vec theta2
    b2 = jax.random.normal(ks[3], (1, emb_dim), jnp.float32) * 0.01
    w6 = lin(ks[4], emb_dim, emb_dim)                                # theta6_v
    b6 = jax.random.normal(ks[5], (1, emb_dim), jnp.float32) * 0.01
    w7 = lin(ks[6], emb_dim, emb_dim)                                # theta7_v
    b7 = jax.random.normal(ks[7], (1, emb_dim), jnp.float32) * 0.01
    # theta5_v1: Linear(2*emb_dim, 1); split into global / local row vectors
    w5g = jax.random.normal(ks[8], (1, emb_dim), jnp.float32) * 0.1
    w5l = jax.random.normal(ks[9], (1, emb_dim), jnp.float32) * 0.1
    b5 = jax.random.normal(ks[10], (1, 1), jnp.float32) * 0.01
    return (w1, b1, w2, b2, w6, b6, w7, b7, w5g, w5l, b5)


# --------------------------------------------------------------------------
# pure-JAX reference mirroring the PyTorch forward (for validation)
# --------------------------------------------------------------------------
def reference(nfm, wadj, reach, params):
    w1, b1, w2, b2, w6, b6, w7, b7, w5g, w5l, b5 = params
    B, N, D = nfm.shape
    E = w1.shape[1]
    h_in = jnp.einsum('bnd,de->bne', nfm, w1) + b1[None]
    mu = jnp.zeros((B, N, E), jnp.float32)
    for _ in range(S2V_T):
        agg = jnp.einsum('bij,bje->bie', wadj, mu)
        mu = jax.nn.relu(h_in + jnp.einsum('bie,ef->bif', agg, w2) + b2[None])

    glob = jnp.einsum('be,ef->bf', jnp.sum(mu, axis=1), w6) + b6     # (B, E)
    glob = jnp.broadcast_to(glob[:, None, :], (B, N, E))
    loc = jnp.einsum('bne,ef->bnf', mu, w7) + b7[None]
    rep = jax.nn.relu(jnp.concatenate([glob, loc], axis=2))          # (B, N, 2E)
    w5 = jnp.concatenate([w5g, w5l], axis=1)                         # (1, 2E)
    q = jnp.einsum('bnf,of->bn', rep, w5) + b5[0, 0]                 # (B, N)
    q = jnp.where(reach != 0.0, q, -1.0e12)
    return jnp.max(q, axis=1)


# --------------------------------------------------------------------------
if __name__ == "__main__":
    key = jax.random.PRNGKey(0)
    B, N, D, E = 20, 8, 4, EMB_DIM                      # small shapes
    k_nfm, k_w, k_r, k_p = jax.random.split(key, 4)

    nfm = jax.random.normal(k_nfm, (B, N, D), jnp.float32)
    wadj = (jax.random.uniform(k_w, (B, N, N)) > 0.5).astype(jnp.float32)
    wadj = wadj * (1.0 - jnp.eye(N, dtype=jnp.float32))  # no self loops
    reach = (jax.random.uniform(k_r, (B, N)) > 0.5).astype(jnp.float32)
    reach = reach.at[:, 0].set(1.0)                      # at least one reachable node
    params = make_params(k_p, D, E)

    v_ref = reference(nfm, wadj, reach, params)

    # multi-block grid (b_blk=8 -> 3 pipelined batch blocks, last one padded)
    v = stuc2vec_valuenet(nfm, wadj, reach, params, b_blk=8)
    jax.block_until_ready(v)
    assert v.shape == (B,)
    assert jnp.allclose(v, v_ref, atol=1e-3, rtol=1e-3), (v, v_ref)

    # auto, padding-aware block sizing (single fat block here)
    v_auto = stuc2vec_valuenet(nfm, wadj, reach, params)
    assert jnp.allclose(v_auto, v_ref, atol=1e-3, rtol=1e-3)

    # packed-X interface (mirrors the PyTorch forward signature)
    X = jnp.concatenate([nfm, wadj, reach[:, :, None]], axis=2)      # (B, N, D+N+1)
    v_packed = stuc2vec_valuenet_packed(X, params, b_blk=8)
    assert jnp.allclose(v_packed, v_ref, atol=1e-3, rtol=1e-3)

    # bf16 MXU-operand fast path: check it compiles, runs and is sane
    v_bf16 = stuc2vec_valuenet(nfm, wadj, reach, params, b_blk=8, use_bf16=True)
    jax.block_until_ready(v_bf16)
    assert v_bf16.shape == (B,) and bool(jnp.all(jnp.isfinite(v_bf16)))

    print("KERNEL_OK")
</pallas_src>

<mosaic_0001>
module attributes {stable_mosaic.version = 11 : i64} {
  func.func @_valuenet_kernel(%arg0: i32, %arg1: memref<8x8x4xf32, #tpu.memory_space<vmem>>, %arg2: memref<8x8x8xf32, #tpu.memory_space<vmem>>, %arg3: memref<8x8xf32, #tpu.memory_space<vmem>>, %arg4: memref<4x32xf32, #tpu.memory_space<vmem>>, %arg5: memref<1x32xf32, #tpu.memory_space<vmem>>, %arg6: memref<32x32xf32, #tpu.memory_space<vmem>>, %arg7: memref<1x32xf32, #tpu.memory_space<vmem>>, %arg8: memref<32x32xf32, #tpu.memory_space<vmem>>, %arg9: memref<1x32xf32, #tpu.memory_space<vmem>>, %arg10: memref<32x32xf32, #tpu.memory_space<vmem>>, %arg11: memref<1x32xf32, #tpu.memory_space<vmem>>, %arg12: memref<1x32xf32, #tpu.memory_space<vmem>>, %arg13: memref<1x32xf32, #tpu.memory_space<vmem>>, %arg14: memref<1x1xf32, #tpu.memory_space<vmem>>, %arg15: memref<1x1x8xf32, #tpu.memory_space<vmem>>) attributes {dimension_semantics = [#tpu.dimension_semantics<parallel>], iteration_bounds = array<i64: 3>, scalar_prefetch = 0 : i64, scratch_operands = 0 : i64, tpu.core_type = #tpu.core_type<tc>, window_params = [{transform_indices = @transform_0, window_bounds = array<i64: 8, 8, 4>}, {transform_indices = @transform_1, window_bounds = array<i64: 8, 8, 8>}, {transform_indices = @transform_2, window_bounds = array<i64: 8, 8>}, {pipeline_mode = #tpu.pipeline_mode<synchronous>, transform_indices = @transform_3, window_bounds = array<i64: 4, 32>}, {pipeline_mode = #tpu.pipeline_mode<synchronous>, transform_indices = @transform_4, window_bounds = array<i64: 1, 32>}, {pipeline_mode = #tpu.pipeline_mode<synchronous>, transform_indices = @transform_5, window_bounds = array<i64: 32, 32>}, {pipeline_mode = #tpu.pipeline_mode<synchronous>, transform_indices = @transform_6, window_bounds = array<i64: 1, 32>}, {pipeline_mode = #tpu.pipeline_mode<synchronous>, transform_indices = @transform_7, window_bounds = array<i64: 32, 32>}, {pipeline_mode = #tpu.pipeline_mode<synchronous>, transform_indices = @transform_8, window_bounds = array<i64: 1, 32>}, {pipeline_mode = #tpu.pipeline_mode<synchronous>, transform_indices = @transform_9, window_bounds = array<i64: 32, 32>}, {pipeline_mode = #tpu.pipeline_mode<synchronous>, transform_indices = @transform_10, window_bounds = array<i64: 1, 32>}, {pipeline_mode = #tpu.pipeline_mode<synchronous>, transform_indices = @transform_11, window_bounds = array<i64: 1, 32>}, {pipeline_mode = #tpu.pipeline_mode<synchronous>, transform_indices = @transform_12, window_bounds = array<i64: 1, 32>}, {pipeline_mode = #tpu.pipeline_mode<synchronous>, transform_indices = @transform_13, window_bounds = array<i64: 1, 1>}, {transform_indices = @transform_14, window_bounds = array<i64: 1, 1, 8>}]} {
    %c0 = arith.constant 0 : index
    %c0_0 = arith.constant 0 : index
    %c0_1 = arith.constant 0 : index
    %0 = vector.load %arg1[%c0, %c0_0, %c0_1] : memref<8x8x4xf32, #tpu.memory_space<vmem>>, vector<8x8x4xf32>
    %c0_2 = arith.constant 0 : index
    %c0_3 = arith.constant 0 : index
    %c0_4 = arith.constant 0 : index
    %1 = vector.load %arg2[%c0_2, %c0_3, %c0_4] : memref<8x8x8xf32, #tpu.memory_space<vmem>>, vector<8x8x8xf32>
    %c0_5 = arith.constant 0 : index
    %c0_6 = arith.constant 0 : index
    %2 = vector.load %arg3[%c0_5, %c0_6] : memref<8x8xf32, #tpu.memory_space<vmem>>, vector<8x8xf32>
    %c0_7 = arith.constant 0 : index
    %c0_8 = arith.constant 0 : index
    %3 = vector.load %arg4[%c0_7, %c0_8] : memref<4x32xf32, #tpu.memory_space<vmem>>, vector<4x32xf32>
    %c0_9 = arith.constant 0 : index
    %c0_10 = arith.constant 0 : index
    %4 = vector.load %arg5[%c0_9, %c0_10] : memref<1x32xf32, #tpu.memory_space<vmem>>, vector<1x32xf32>
    %c0_11 = arith.constant 0 : index
    %c0_12 = arith.constant 0 : index
    %5 = vector.load %arg6[%c0_11, %c0_12] : memref<32x32xf32, #tpu.memory_space<vmem>>, vector<32x32xf32>
    %c0_13 = arith.constant 0 : index
    %c0_14 = arith.constant 0 : index
    %6 = vector.load %arg7[%c0_13, %c0_14] : memref<1x32xf32, #tpu.memory_space<vmem>>, vector<1x32xf32>
    %c0_15 = arith.constant 0 : index
    %c0_16 = arith.constant 0 : index
    %7 = vector.load %arg8[%c0_15, %c0_16] : memref<32x32xf32, #tpu.memory_space<vmem>>, vector<32x32xf32>
    %c0_17 = arith.constant 0 : index
    %c0_18 = arith.constant 0 : index
    %8 = vector.load %arg9[%c0_17, %c0_18] : memref<1x32xf32, #tpu.memory_space<vmem>>, vector<1x32xf32>
    %c0_19 = arith.constant 0 : index
    %c0_20 = arith.constant 0 : index
    %9 = vector.load %arg10[%c0_19, %c0_20] : memref<32x32xf32, #tpu.memory_space<vmem>>, vector<32x32xf32>
    %c0_21 = arith.constant 0 : index
    %c0_22 = arith.constant 0 : index
    %10 = vector.load %arg11[%c0_21, %c0_22] : memref<1x32xf32, #tpu.memory_space<vmem>>, vector<1x32xf32>
    %c0_23 = arith.constant 0 : index
    %c0_24 = arith.constant 0 : index
    %11 = vector.load %arg12[%c0_23, %c0_24] : memref<1x32xf32, #tpu.memory_space<vmem>>, vector<1x32xf32>
    %c0_25 = arith.constant 0 : index
    %c0_26 = arith.constant 0 : index
    %12 = vector.load %arg13[%c0_25, %c0_26] : memref<1x32xf32, #tpu.memory_space<vmem>>, vector<1x32xf32>
    %c0_27 = arith.constant 0 : index
    %c0_28 = arith.constant 0 : index
    %13 = vector.load %arg14[%c0_27, %c0_28] : memref<1x1xf32, #tpu.memory_space<vmem>>, vector<1x1xf32>
    %14 = vector.shape_cast %0 : vector<8x8x4xf32> to vector<64x4xf32>
    %cst = arith.constant dense<0.000000e+00> : vector<64x32xf32>
    %15 = tpu.matmul %14, %3, %cst {dimension_numbers = #tpu.dot_dimension_numbers<[1], [0], [0], [1], [0, 0, 1, 1], [], []>} : vector<64x4xf32>, vector<4x32xf32>, vector<64x32xf32> -> vector<64x32xf32>
    %16 = arith.addf %4, %6 : vector<1x32xf32>
    %17 = vector.broadcast %16 : vector<1x32xf32> to vector<64x32xf32>
    %18 = arith.addf %15, %17 : vector<64x32xf32>
    %19 = vector.shape_cast %18 : vector<64x32xf32> to vector<8x8x32xf32>
    %20 = vector.extract_strided_slice %1 {offsets = [0, 0, 0], sizes = [8, 8, 1], strides = [1, 1, 1]} : vector<8x8x8xf32> to vector<8x8x1xf32>
    %21 = vector.extract_strided_slice %1 {offsets = [0, 0, 1], sizes = [8, 8, 1], strides = [1, 1, 1]} : vector<8x8x8xf32> to vector<8x8x1xf32>
    %22 = vector.extract_strided_slice %1 {offsets = [0, 0, 2], sizes = [8, 8, 1], strides = [1, 1, 1]} : vector<8x8x8xf32> to vector<8x8x1xf32>
    %23 = vector.extract_strided_slice %1 {offsets = [0, 0, 3], sizes = [8, 8, 1], strides = [1, 1, 1]} : vector<8x8x8xf32> to vector<8x8x1xf32>
    %24 = vector.extract_strided_slice %1 {offsets = [0, 0, 4], sizes = [8, 8, 1], strides = [1, 1, 1]} : vector<8x8x8xf32> to vector<8x8x1xf32>
    %25 = vector.extract_strided_slice %1 {offsets = [0, 0, 5], sizes = [8, 8, 1], strides = [1, 1, 1]} : vector<8x8x8xf32> to vector<8x8x1xf32>
    %26 = vector.extract_strided_slice %1 {offsets = [0, 0, 6], sizes = [8, 8, 1], strides = [1, 1, 1]} : vector<8x8x8xf32> to vector<8x8x1xf32>
    %27 = vector.extract_strided_slice %1 {offsets = [0, 0, 7], sizes = [8, 8, 1], strides = [1, 1, 1]} : vector<8x8x8xf32> to vector<8x8x1xf32>
    %cst_29 = arith.constant 0.000000e+00 : f32
    %28 = vector.broadcast %cst_29 : f32 to vector<8x8x32xf32>
    %29 = arith.maximumf %19, %28 : vector<8x8x32xf32>
    %30 = vector.shape_cast %29 : vector<8x8x32xf32> to vector<64x32xf32>
    %cst_30 = arith.constant dense<0.000000e+00> : vector<64x32xf32>
    %31 = tpu.matmul %30, %5, %cst_30 {dimension_numbers = #tpu.dot_dimension_numbers<[1], [0], [0], [1], [0, 0, 1, 1], [], []>} : vector<64x32xf32>, vector<32x32xf32>, vector<64x32xf32> -> vector<64x32xf32>
    %32 = vector.shape_cast %31 : vector<64x32xf32> to vector<8x8x32xf32>
    %33 = vector.extract_strided_slice %32 {offsets = [0, 0, 0], sizes = [8, 1, 32], strides = [1, 1, 1]} : vector<8x8x32xf32> to vector<8x1x32xf32>
    %34 = vector.broadcast %20 : vector<8x8x1xf32> to vector<8x8x32xf32>
    %35 = vector.broadcast %33 : vector<8x1x32xf32> to vector<8x8x32xf32>
    %36 = arith.mulf %34, %35 : vector<8x8x32xf32>
    %37 = vector.extract_strided_slice %32 {offsets = [0, 1, 0], sizes = [8, 1, 32], strides = [1, 1, 1]} : vector<8x8x32xf32> to vector<8x1x32xf32>
    %38 = vector.broadcast %21 : vector<8x8x1xf32> to vector<8x8x32xf32>
    %39 = vector.broadcast %37 : vector<8x1x32xf32> to vector<8x8x32xf32>
    %40 = arith.mulf %38, %39 : vector<8x8x32xf32>
    %41 = arith.addf %36, %40 : vector<8x8x32xf32>
    %42 = vector.extract_strided_slice %32 {offsets = [0, 2, 0], sizes = [8, 1, 32], strides = [1, 1, 1]} : vector<8x8x32xf32> to vector<8x1x32xf32>
    %43 = vector.broadcast %22 : vector<8x8x1xf32> to vector<8x8x32xf32>
    %44 = vector.broadcast %42 : vector<8x1x32xf32> to vector<8x8x32xf32>
    %45 = arith.mulf %43, %44 : vector<8x8x32xf32>
    %46 = arith.addf %41, %45 : vector<8x8x32xf32>
    %47 = vector.extract_strided_slice %32 {offsets = [0, 3, 0], sizes = [8, 1, 32], strides = [1, 1, 1]} : vector<8x8x32xf32> to vector<8x1x32xf32>
    %48 = vector.broadcast %23 : vector<8x8x1xf32> to vector<8x8x32xf32>
    %49 = vector.broadcast %47 : vector<8x1x32xf32> to vector<8x8x32xf32>
    %50 = arith.mulf %48, %49 : vector<8x8x32xf32>
    %51 = arith.addf %46, %50 : vector<8x8x32xf32>
    %52 = vector.extract_strided_slice %32 {offsets = [0, 4, 0], sizes = [8, 1, 32], strides = [1, 1, 1]} : vector<8x8x32xf32> to vector<8x1x32xf32>
    %53 = vector.broadcast %24 : vector<8x8x1xf32> to vector<8x8x32xf32>
    %54 = vector.broadcast %52 : vector<8x1x32xf32> to vector<8x8x32xf32>
    %55 = arith.mulf %53, %54 : vector<8x8x32xf32>
    %56 = arith.addf %51, %55 : vector<8x8x32xf32>
    %57 = vector.extract_strided_slice %32 {offsets = [0, 5, 0], sizes = [8, 1, 32], strides = [1, 1, 1]} : vector<8x8x32xf32> to vector<8x1x32xf32>
    %58 = vector.broadcast %25 : vector<8x8x1xf32> to vector<8x8x32xf32>
    %59 = vector.broadcast %57 : vector<8x1x32xf32> to vector<8x8x32xf32>
    %60 = arith.mulf %58, %59 : vector<8x8x32xf32>
    %61 = arith.addf %56, %60 : vector<8x8x32xf32>
    %62 = vector.extract_strided_slice %32 {offsets = [0, 6, 0], sizes = [8, 1, 32], strides = [1, 1, 1]} : vector<8x8x32xf32> to vector<8x1x32xf32>
    %63 = vector.broadcast %26 : vector<8x8x1xf32> to vector<8x8x32xf32>
    %64 = vector.broadcast %62 : vector<8x1x32xf32> to vector<8x8x32xf32>
    %65 = arith.mulf %63, %64 : vector<8x8x32xf32>
    %66 = arith.addf %61, %65 : vector<8x8x32xf32>
    %67 = vector.extract_strided_slice %32 {offsets = [0, 7, 0], sizes = [8, 1, 32], strides = [1, 1, 1]} : vector<8x8x32xf32> to vector<8x1x32xf32>
    %68 = vector.broadcast %27 : vector<8x8x1xf32> to vector<8x8x32xf32>
    %69 = vector.broadcast %67 : vector<8x1x32xf32> to vector<8x8x32xf32>
    %70 = arith.mulf %68, %69 : vector<8x8x32xf32>
    %71 = arith.addf %66, %70 : vector<8x8x32xf32>
    %72 = arith.addf %19, %71 : vector<8x8x32xf32>
    %cst_31 = arith.constant 0.000000e+00 : f32
    %73 = vector.broadcast %cst_31 : f32 to vector<8x8x32xf32>
    %74 = arith.maximumf %72, %73 : vector<8x8x32xf32>
    %75 = vector.shape_cast %74 : vector<8x8x32xf32> to vector<64x32xf32>
    %cst_32 = arith.constant dense<0.000000e+00> : vector<64x32xf32>
    %76 = tpu.matmul %75, %5, %cst_32 {dimension_numbers = #tpu.dot_dimension_numbers<[1], [0], [0], [1], [0, 0, 1, 1], [], []>} : vector<64x32xf32>, vector<32x32xf32>, vector<64x32xf32> -> vector<64x32xf32>
    %77 = vector.shape_cast %76 : vector<64x32xf32> to vector<8x8x32xf32>
    %78 = vector.extract_strided_slice %77 {offsets = [0, 0, 0], sizes = [8, 1, 32], strides = [1, 1, 1]} : vector<8x8x32xf32> to vector<8x1x32xf32>
    %79 = vector.broadcast %20 : vector<8x8x1xf32> to vector<8x8x32xf32>
    %80 = vector.broadcast %78 : vector<8x1x32xf32> to vector<8x8x32xf32>
    %81 = arith.mulf %79, %80 : vector<8x8x32xf32>
    %82 = vector.extract_strided_slice %77 {offsets = [0, 1, 0], sizes = [8, 1, 32], strides = [1, 1, 1]} : vector<8x8x32xf32> to vector<8x1x32xf32>
    %83 = vector.broadcast %21 : vector<8x8x1xf32> to vector<8x8x32xf32>
    %84 = vector.broadcast %82 : vector<8x1x32xf32> to vector<8x8x32xf32>
    %85 = arith.mulf %83, %84 : vector<8x8x32xf32>
    %86 = arith.addf %81, %85 : vector<8x8x32xf32>
    %87 = vector.extract_strided_slice %77 {offsets = [0, 2, 0], sizes = [8, 1, 32], strides = [1, 1, 1]} : vector<8x8x32xf32> to vector<8x1x32xf32>
    %88 = vector.broadcast %22 : vector<8x8x1xf32> to vector<8x8x32xf32>
    %89 = vector.broadcast %87 : vector<8x1x32xf32> to vector<8x8x32xf32>
    %90 = arith.mulf %88, %89 : vector<8x8x32xf32>
    %91 = arith.addf %86, %90 : vector<8x8x32xf32>
    %92 = vector.extract_strided_slice %77 {offsets = [0, 3, 0], sizes = [8, 1, 32], strides = [1, 1, 1]} : vector<8x8x32xf32> to vector<8x1x32xf32>
    %93 = vector.broadcast %23 : vector<8x8x1xf32> to vector<8x8x32xf32>
    %94 = vector.broadcast %92 : vector<8x1x32xf32> to vector<8x8x32xf32>
    %95 = arith.mulf %93, %94 : vector<8x8x32xf32>
    %96 = arith.addf %91, %95 : vector<8x8x32xf32>
    %97 = vector.extract_strided_slice %77 {offsets = [0, 4, 0], sizes = [8, 1, 32], strides = [1, 1, 1]} : vector<8x8x32xf32> to vector<8x1x32xf32>
    %98 = vector.broadcast %24 : vector<8x8x1xf32> to vector<8x8x32xf32>
    %99 = vector.broadcast %97 : vector<8x1x32xf32> to vector<8x8x32xf32>
    %100 = arith.mulf %98, %99 : vector<8x8x32xf32>
    %101 = arith.addf %96, %100 : vector<8x8x32xf32>
    %102 = vector.extract_strided_slice %77 {offsets = [0, 5, 0], sizes = [8, 1, 32], strides = [1, 1, 1]} : vector<8x8x32xf32> to vector<8x1x32xf32>
    %103 = vector.broadcast %25 : vector<8x8x1xf32> to vector<8x8x32xf32>
    %104 = vector.broadcast %102 : vector<8x1x32xf32> to vector<8x8x32xf32>
    %105 = arith.mulf %103, %104 : vector<8x8x32xf32>
    %106 = arith.addf %101, %105 : vector<8x8x32xf32>
    %107 = vector.extract_strided_slice %77 {offsets = [0, 6, 0], sizes = [8, 1, 32], strides = [1, 1, 1]} : vector<8x8x32xf32> to vector<8x1x32xf32>
    %108 = vector.broadcast %26 : vector<8x8x1xf32> to vector<8x8x32xf32>
    %109 = vector.broadcast %107 : vector<8x1x32xf32> to vector<8x8x32xf32>
    %110 = arith.mulf %108, %109 : vector<8x8x32xf32>
    %111 = arith.addf %106, %110 : vector<8x8x32xf32>
    %112 = vector.extract_strided_slice %77 {offsets = [0, 7, 0], sizes = [8, 1, 32], strides = [1, 1, 1]} : vector<8x8x32xf32> to vector<8x1x32xf32>
    %113 = vector.broadcast %27 : vector<8x8x1xf32> to vector<8x8x32xf32>
    %114 = vector.broadcast %112 : vector<8x1x32xf32> to vector<8x8x32xf32>
    %115 = arith.mulf %113, %114 : vector<8x8x32xf32>
    %116 = arith.addf %111, %115 : vector<8x8x32xf32>
    %117 = arith.addf %19, %116 : vector<8x8x32xf32>
    %cst_33 = arith.constant 0.000000e+00 : f32
    %118 = vector.broadcast %cst_33 : f32 to vector<8x8x32xf32>
    %119 = arith.maximumf %117, %118 : vector<8x8x32xf32>
    %cst_34 = arith.constant dense<0.000000e+00> : vector<8x32xf32>
    %120 = vector.multi_reduction <add>, %119, %cst_34 [1] : vector<8x8x32xf32> to vector<8x32xf32>
    %cst_35 = arith.constant dense<0.000000e+00> : vector<8x32xf32>
    %121 = tpu.matmul %120, %7, %cst_35 {dimension_numbers = #tpu.dot_dimension_numbers<[1], [0], [0], [1], [0, 0, 1, 1], [], []>} : vector<8x32xf32>, vector<32x32xf32>, vector<8x32xf32> -> vector<8x32xf32>
    %122 = vector.broadcast %8 : vector<1x32xf32> to vector<8x32xf32>
    %123 = arith.addf %121, %122 : vector<8x32xf32>
    %cst_36 = arith.constant 0.000000e+00 : f32
    %124 = vector.broadcast %cst_36 : f32 to vector<8x32xf32>
    %125 = arith.maximumf %123, %124 : vector<8x32xf32>
    %126 = vector.shape_cast %119 : vector<8x8x32xf32> to vector<64x32xf32>
    %cst_37 = arith.constant dense<0.000000e+00> : vector<64x32xf32>
    %127 = tpu.matmul %126, %9, %cst_37 {dimension_numbers = #tpu.dot_dimension_numbers<[1], [0], [0], [1], [0, 0, 1, 1], [], []>} : vector<64x32xf32>, vector<32x32xf32>, vector<64x32xf32> -> vector<64x32xf32>
    %128 = vector.broadcast %10 : vector<1x32xf32> to vector<64x32xf32>
    %129 = arith.addf %127, %128 : vector<64x32xf32>
    %cst_38 = arith.constant 0.000000e+00 : f32
    %130 = vector.broadcast %cst_38 : f32 to vector<64x32xf32>
    %131 = arith.maximumf %129, %130 : vector<64x32xf32>
    %132 = vector.broadcast %11 : vector<1x32xf32> to vector<8x32xf32>
    %133 = arith.mulf %125, %132 : vector<8x32xf32>
    %cst_39 = arith.constant dense<0.000000e+00> : vector<8xf32>
    %134 = vector.multi_reduction <add>, %133, %cst_39 [1] : vector<8x32xf32> to vector<8xf32>
    %135 = vector.shape_cast %131 : vector<64x32xf32> to vector<8x8x32xf32>
    %136 = vector.shape_cast %12 : vector<1x32xf32> to vector<1x1x32xf32>
    %137 = vector.broadcast %136 : vector<1x1x32xf32> to vector<8x8x32xf32>
    %138 = arith.mulf %135, %137 : vector<8x8x32xf32>
    %cst_40 = arith.constant dense<0.000000e+00> : vector<8x8xf32>
    %139 = vector.multi_reduction <add>, %138, %cst_40 [2] : vector<8x8x32xf32> to vector<8x8xf32>
    %140 = vector.shape_cast %134 : vector<8xf32> to vector<8x1xf32>
    %141 = vector.broadcast %140 : vector<8x1xf32> to vector<8x8xf32>
    %142 = arith.addf %139, %141 : vector<8x8xf32>
    %143 = vector.extract %13[0, 0] : f32 from vector<1x1xf32>
    %144 = vector.broadcast %143 : f32 to vector<8x8xf32>
    %145 = arith.addf %142, %144 : vector<8x8xf32>
    %cst_41 = arith.constant 0.000000e+00 : f32
    %146 = vector.broadcast %cst_41 : f32 to vector<8x8xf32>
    %147 = arith.cmpf one, %2, %146 : vector<8x8xf32>
    %cst_42 = arith.constant -9.99999995E+11 : f32
    %148 = vector.broadcast %cst_42 : f32 to vector<8x8xf32>
    %149 = arith.select %147, %145, %148 : vector<8x8xi1>, vector<8x8xf32>
    %cst_43 = arith.constant dense<0xFF800000> : vector<8xf32>
    %150 = vector.multi_reduction <maximumf>, %149, %cst_43 [1] : vector<8x8xf32> to vector<8xf32>
    %151 = vector.shape_cast %150 : vector<8xf32> to vector<1x1x8xf32>
    %c0_44 = arith.constant 0 : index
    %c0_45 = arith.constant 0 : index
    %c0_46 = arith.constant 0 : index
    %152 = vector.load %arg15[%c0_44, %c0_45, %c0_46] : memref<1x1x8xf32, #tpu.memory_space<vmem>>, vector<1x1x8xf32>
    tpu.vector_store %arg15[%c0_44, %c0_45, %c0_46], %151 {strides = array<i32>} : memref<1x1x8xf32, #tpu.memory_space<vmem>>, vector<1x1x8xf32>,
    return
  }
  func.func @transform_0(%arg0: i32) -> (i32, i32, i32) {
    %c0_i32 = arith.constant 0 : i32
    %c0_i32_0 = arith.constant 0 : i32
    %c0_i32_1 = arith.constant 0 : i32
    return %arg0, %c0_i32, %c0_i32_0 : i32, i32, i32
  }
  func.func @transform_1(%arg0: i32) -> (i32, i32, i32) {
    %c0_i32 = arith.constant 0 : i32
    %c0_i32_0 = arith.constant 0 : i32
    %c0_i32_1 = arith.constant 0 : i32
    return %arg0, %c0_i32, %c0_i32_0 : i32, i32, i32
  }
  func.func @transform_2(%arg0: i32) -> (i32, i32) {
    %c0_i32 = arith.constant 0 : i32
    %c0_i32_0 = arith.constant 0 : i32
    return %arg0, %c0_i32 : i32, i32
  }
  func.func @transform_3(%arg0: i32) -> (i32, i32) {
    %c0_i32 = arith.constant 0 : i32
    %c0_i32_0 = arith.constant 0 : i32
    %c0_i32_1 = arith.constant 0 : i32
    return %c0_i32, %c0_i32_0 : i32, i32
  }
  func.func @transform_4(%arg0: i32) -> (i32, i32) {
    %c0_i32 = arith.constant 0 : i32
    %c0_i32_0 = arith.constant 0 : i32
    %c0_i32_1 = arith.constant 0 : i32
    return %c0_i32, %c0_i32_0 : i32, i32
  }
  func.func @transform_5(%arg0: i32) -> (i32, i32) {
    %c0_i32 = arith.constant 0 : i32
    %c0_i32_0 = arith.constant 0 : i32
    %c0_i32_1 = arith.constant 0 : i32
    return %c0_i32, %c0_i32_0 : i32, i32
  }
  func.func @transform_6(%arg0: i32) -> (i32, i32) {
    %c0_i32 = arith.constant 0 : i32
    %c0_i32_0 = arith.constant 0 : i32
    %c0_i32_1 = arith.constant 0 : i32
    return %c0_i32, %c0_i32_0 : i32, i32
  }
  func.func @transform_7(%arg0: i32) -> (i32, i32) {
    %c0_i32 = arith.constant 0 : i32
    %c0_i32_0 = arith.constant 0 : i32
    %c0_i32_1 = arith.constant 0 : i32
    return %c0_i32, %c0_i32_0 : i32, i32
  }
  func.func @transform_8(%arg0: i32) -> (i32, i32) {
    %c0_i32 = arith.constant 0 : i32
    %c0_i32_0 = arith.constant 0 : i32
    %c0_i32_1 = arith.constant 0 : i32
    return %c0_i32, %c0_i32_0 : i32, i32
  }
  func.func @transform_9(%arg0: i32) -> (i32, i32) {
    %c0_i32 = arith.constant 0 : i32
    %c0_i32_0 = arith.constant 0 : i32
    %c0_i32_1 = arith.constant 0 : i32
    return %c0_i32, %c0_i32_0 : i32, i32
  }
  func.func @transform_10(%arg0: i32) -> (i32, i32) {
    %c0_i32 = arith.constant 0 : i32
    %c0_i32_0 = arith.constant 0 : i32
    %c0_i32_1 = arith.constant 0 : i32
    return %c0_i32, %c0_i32_0 : i32, i32
  }
  func.func @transform_11(%arg0: i32) -> (i32, i32) {
    %c0_i32 = arith.constant 0 : i32
    %c0_i32_0 = arith.constant 0 : i32
    %c0_i32_1 = arith.constant 0 : i32
    return %c0_i32, %c0_i32_0 : i32, i32
  }
  func.func @transform_12(%arg0: i32) -> (i32, i32) {
    %c0_i32 = arith.constant 0 : i32
    %c0_i32_0 = arith.constant 0 : i32
    %c0_i32_1 = arith.constant 0 : i32
    return %c0_i32, %c0_i32_0 : i32, i32
  }
  func.func @transform_13(%arg0: i32) -> (i32, i32) {
    %c0_i32 = arith.constant 0 : i32
    %c0_i32_0 = arith.constant 0 : i32
    %c0_i32_1 = arith.constant 0 : i32
    return %c0_i32, %c0_i32_0 : i32, i32
  }
  func.func @transform_14(%arg0: i32) -> (i32, i32, i32) {
    %c0_i32 = arith.constant 0 : i32
    %c0_i32_0 = arith.constant 0 : i32
    %c0_i32_1 = arith.constant 0 : i32
    return %arg0, %c0_i32, %c0_i32_0 : i32, i32, i32
  }
}

</mosaic_0001>

<bundles_post_ra>
// kernel: _valuenet_call.1
= control target key start
LH: loop header
LB: loop body
LE: loop exit
PB: predicated region body
PF: predicated region fallthrough
CT: control target
= control target key end

     0   :  { %s2947_s15 = smov 0   ;;  %s3965_s0 = inlined_call_operand.vmem [shape: f32[24,8,4], index: 0, kind: input, shape index: {}]   ;;  %s3966_s1 = inlined_call_operand.vmem [shape: f32[24,8,8], index: 1, kind: input, shape index: {}]   ;;  %s3967_s2 = inlined_call_operand.vmem [shape: f32[24,8], index: 2, kind: input, shape index: {}]   ;;  %s3968_s3 = inlined_call_operand.vmem [shape: f32[4,32], index: 3, kind: input, shape index: {}]   ;;  %s3969_s4 = inlined_call_operand.vmem [shape: f32[1,32], index: 4, kind: input, shape index: {}]   ;;  %s3970_s5 = inlined_call_operand.vmem [shape: f32[32,32], index: 5, kind: input, shape index: {}]   ;;  %s3971_s6 = inlined_call_operand.vmem [shape: f32[1,32], index: 6, kind: input, shape index: {}]   ;;  %s3972_s7 = inlined_call_operand.vmem [shape: f32[32,32], index: 7, kind: input, shape index: {}]   ;;  %s3973_s8 = inlined_call_operand.vmem [shape: f32[1,32], index: 8, kind: input, shape index: {}]   ;;  %s3974_s9 = inlined_call_operand.vmem [shape: f32[32,32], index: 9, kind: input, shape index: {}]   ;;  %s3975_s10 = inlined_call_operand.vmem [shape: f32[1,32], index: 10, kind: input, shape index: {}]   ;;  %s3976_s11 = inlined_call_operand.vmem [shape: f32[1,32], index: 11, kind: input, shape index: {}]   ;;  %s3977_s12 = inlined_call_operand.vmem [shape: f32[1,32], index: 12, kind: input, shape index: {}]   ;;  %s3978_s13 = inlined_call_operand.<no memory space> [shape: f32[1,1], index: 13, kind: input, shape index: {}]   ;;  %s3979_s14 = inlined_call_operand.vmem [shape: f32[3,1,8], index: 14, kind: output, shape index: {}]  }
   0x1   :  { %v19_v0 = vstv %s3978_s13 }
   0x2   :  { %20 = vst [vmem:[#allocation2] sm:$0x1] %v19_v0 }
   0x3 LB: > { %s2953_s16 = sadd.s32 4294967295, %s2856_s15   ;;  %p2570_p0 = scmp.ge.s32.totalorder %s2856_s15, 1  ;;  %s2856_s15 = sphi %s2947_s15, %s26_s15  }
   0x4   : > { %p435_p1 = scmp.lt.s32.totalorder %s2856_s15, 4 }
   0x6   : > { %p436_p2 = pnand %p2570_p0, %p435_p1 }
   0x8   : > { %439 = sbr.rel (%p436_p2) target bundleno = 1465 (0x5b9), region = 76 }
   0xf   : > { %v524_v1 = vld [vmem:[%s3968_s3] sm:$0xf]  ;;  %vm576_vm0 = vcmask 1043456   ;;  %s2571_s13 = sshll.u32 %s2953_s16, 3  ;;  %v2858_v2 = vmov 0   ;;  %v527_v4 = vld [vmem:[%s3970_s5 + $0x8] sm:$0xff]  ;;  %v3980_v32 = vlaneseq }
  0x10   : > { %2666 = vmatprep.subr.msk.mxu0 %vm576_vm0, %v524_v1  ;;  %p489_p3 = scmp.lt.s32.totalorder %s2571_s13, 23  ;;  %2802 = vset.pattern.permute.xlu1 %v2858_v2  ;;  %v526_v3 = vld [vmem:[%s3970_s5] sm:$0xff]  ;;  %v2859_v5 = vmov 2   ;;  %vm551_vm1 = vcmask 31744   ;;  %v2860_v14 = vmov 1   ;;  %v2861_v17 = vmov 3  }
  0x11   : > { %2667 = vmatpush3.msk.msra.mxu0 %vm576_vm0, %v524_v1  ;;  %2805 = vset.pattern.permute.xlu0 %v2859_v5  ;;  %v2751_v6 = vpack.c.bf16 %v527_v4, %v526_v3  ;;  %v2862_v22 = vmov 4   ;;  %v2863_v24 = vmov 5   ;;  %v2864_v25 = vmov 6   ;;  %v528_v26 = vld [vmem:[%s3970_s5 + $0x10] sm:$0xff]  ;;  %v529_v27 = vld [vmem:[%s3970_s5 + $0x18] sm:$0xff]  ;;  %p500_p4 = scmp.lt.s32.totalorder %s2953_s16, 2 }
  0x12   : > { %s4224_s13 = smov (!%p489_p3, %s2571_s13), 23  ;;  %v2755_v29 = vpack.c.bf16 %v529_v27, %v528_v26  ;;  %v2865_v31 = vmov 7   ;;  %v3109_v33 = vshrl.u32 %v3980_v32, 7  ;;  %v525_v34 = vld [vmem:[%s3969_s4] sm:$0x1]  ;;  %vm693_vm2 = vcmask 261120  }
  0x13   : > { %s2572_s23 = sshll.u32 %s4224_s13, 3  ;;  %2752 = vmatprep.subr.bf16.mxu1 %v2751_v6  ;;  %2760 = vmatprep.subr.bf16.mxu0 %v2751_v6  ;;  %v530_v35 = vld [vmem:[%s3971_s6] sm:$0x1]  ;;  %vm2867_vm3 = vmmov 0   ;;  %vm2070_vm4 = vcmask 1041409   ;;  %vm2072_vm5 = vcmask 1042434  }
  0x14   : > { %s492_s26 = scalar_lea.vmem %s3965_s0, %s2572_s23  ;;  %s2975_s29 = scalar_lea.vmem %s3966_s1, %s2572_s23  ;;  %2754 = vmatpush3.bf16.msra.mxu1 %v2751_v6  ;;  %4053 = vst [vmem:[#allocation3_spill] sm:$0xff] %v3109_v33  ;;  %v544_v36 = vadd.f32 %v530_v35, %v525_v34  ;;  %v3119_v37 = vsub.s32 0, %v3109_v33  ;;  %vm2074_vm6 = vcmask 1043459   ;;  %vm2076_vm7 = vcmask 1044484  }
  0x15   : > { %v507_v7 = vld [vmem:[%s492_s26] sm:$0xff]  ;;  %v508_v8 = vld [vmem:[%s492_s26 + $0x8] sm:$0xff]  ;;  %v509_v9 = vld [vmem:[%s492_s26 + $0x10] sm:$0xff]  ;;  %2756 = vmatprep.subr.bf16.mxu1 %v2755_v29  ;;  %vm2078_vm8 = vcmask 1045509   ;;  %vm2080_vm9 = vcmask 1046534   ;;  %vm2082_vm10 = vcmask 1047559  }
  0x16   : > { %2668 = vmatprep.mubr.msk.f32.mxu0 %vm551_vm1, %v507_v7  ;;  %v2980_v10 = vld [vmem:[%s2975_s29 + $0x8] sm:$0xff]  ;;  %v510_v11 = vld [vmem:[%s492_s26 + $0x18] sm:$0xff]  ;;  %v511_v12 = vld [vmem:[%s492_s26 + $0x20] sm:$0xff]  ;;  %4054 = vst [vmem:[#allocation4_spill] sm:$0xff] %v3119_v37  ;;  %v549_v38 = vrot.slane %v544_v36, %v3119_v37  ;;  %s4226_s16 = smov (!%p500_p4, %s2953_s16), 2  ;;  %vm2483_vm12 = vcmask 64512  }
  0x17   : > { %2669 = vmatmul.mubr.msk.f32.vlgmr.msra.gmra.mrb[0].mxu0 %vm551_vm1, %v508_v8  ;;  %830 = vperm.xlu1 %2802, %v2980_v10   ;;  %v512_v13 = vld [vmem:[%s492_s26 + $0x28] sm:$0xff]  ;;  %v513_v15 = vld [vmem:[%s492_s26 + $0x30] sm:$0xff]  ;;  %v2990_v16 = vld [vmem:[%s2975_s29] sm:$0xff]  ;;  %s2575_s13 = sshll.u32 %s4226_s16, 3  ;;  %s506_s24 = scalar_lea.vmem %s3979_s14, %s4226_s16  ;;  %vm2493_vm13 = vcmask 57344  }
  0x18   : > { %2671 = vmatprep.mubr.msk.f32.mxu0 %vm551_vm1, %v509_v9  ;;  %988 = vperm.xlu0 %2805, %v2980_v10   ;;  %v514_v18 = vld [vmem:[%s492_s26 + $0x38] sm:$0xff]  ;;  %v3001_v19 = vld [vmem:[%s2975_s29 + $0x10] sm:$0xff]  ;;  %v3014_v21 = vld [vmem:[%s2975_s29 + $0x20] sm:$0xff]  ;;  %s503_s21 = scalar_lea.vmem %s3967_s2, %s2575_s13 }
  0x19   : > { %2762 = vmatpush3.bf16.msra.mxu0 %v2751_v6  ;;  %v3004_v20 = vld [vmem:[%s2975_s29 + $0x18] sm:$0xff]  ;;  %v3031_v23 = vld [vmem:[%s2975_s29 + $0x28] sm:$0xff]  ;;  %v3051_v28 = vld [vmem:[%s2975_s29 + $0x30] sm:$0xff]  ;;  %2758 = vmatpush3.bf16.msra.mxu1 %v2755_v29 }
  0x1a   : > { %2764 = vmatprep.subr.bf16.mxu0 %v2755_v29  ;;  %v522_v30 = vld [vmem:[%s2975_s29 + $0x38] sm:$0xff] }
  0x1b   : > { %2672 = vmatmul.mubr.msk.f32.gmra.mrb[2].mxu0 %vm551_vm1, %v510_v11  ;;  %2803 = vset.pattern.permute.xlu1 %v2860_v14 }
  0x1c   : > { %2674 = vmatprep.mubr.msk.f32.mxu0 %vm551_vm1, %v511_v12  ;;  %908 = vperm.xlu1 %2803, %v2980_v10  }
  0x1d   : > { %2808 = vset.pattern.permute.xlu0 %v2861_v17  ;;  %2766 = vmatpush3.bf16.msra.mxu0 %v2755_v29 }
  0x1e   : > { %1064 = vperm.xlu0 %2808, %v2990_v16  }
  0x1f   : > { %2675 = vmatmul.mubr.msk.f32.gmra.mrb[4].mxu0 %vm551_vm1, %v512_v13 }
  0x20   : > { %2677 = vmatprep.mubr.msk.f32.mxu0 %vm551_vm1, %v513_v15  ;;  %2804 = vset.pattern.permute.xlu1 %v2859_v5 }
  0x21   : > { %984 = vperm.xlu1 %2804, %v2990_v16  }
  0x22   : > { %1068 = vperm.xlu0 %2808, %v2980_v10  }
  0x23   : > { %2678 = vmatmul.mubr.msk.f32.gmra.mrb[6].mxu0 %vm551_vm1, %v514_v18 }
  0x25   : > { %2806 = vset.pattern.permute.xlu1 %v2858_v2 }
  0x26   : > { %1076 = vperm.xlu0 %2808, %v3004_v20   ;;  %835 = vperm.xlu1 %2806, %v3001_v19  }
  0x2a   : > { %2817 = vset.pattern.permute.xlu0 %v2858_v2  ;;  %2807 = vset.pattern.permute.xlu1 %v2860_v14 }
  0x2b   : > { %825 = vperm.xlu0 %2817, %v2990_v16   ;;  %912 = vperm.xlu1 %2807, %v3001_v19  }
  0x2f   : > { %845 = vperm.xlu0 %2817, %v3014_v21   ;;  %2809 = vset.pattern.permute.xlu1 %v2858_v2 }
  0x30   : > { %840 = vperm.xlu1 %2809, %v3004_v20  }
  0x33   : > { %855 = vperm.xlu0 %2817, %v3051_v28  }
  0x34   : > { %2810 = vset.pattern.permute.xlu1 %v2860_v14 }
  0x35   : > { %916 = vperm.xlu1 %2810, %v3004_v20  }
  0x37   : > { %2823 = vset.pattern.permute.xlu0 %v2860_v14 }
  0x38   : > { %904 = vperm.xlu0 %2823, %v2990_v16  }
  0x39   : > { %2811 = vset.pattern.permute.xlu1 %v2859_v5 }
  0x3a   : > { %992 = vperm.xlu1 %2811, %v3001_v19  }
  0x3c   : > { %932 = vperm.xlu0 %2823, %v522_v30  }
  0x3e   : > { %996 = vperm.xlu1 %2811, %v3004_v20  }
  0x40   : > { %2830 = vset.pattern.permute.xlu0 %v2865_v31 }
  0x41   : > { %1388 = vperm.xlu0 %2830, %v2980_v10  }
  0x42   : > { %2812 = vset.pattern.permute.xlu1 %v2862_v22 }
  0x43   : > { %1148 = vperm.xlu1 %2812, %v2980_v10  }
  0x45   : > { %2831 = vset.pattern.permute.xlu0 %v2862_v22 }
  0x46   : > { %1144 = vperm.xlu0 %2831, %v2990_v16  }
  0x47   : > { %2813 = vset.pattern.permute.xlu1 %v2860_v14 }
  0x48   : > { %920 = vperm.xlu1 %2813, %v3014_v21  }
  0x4a   : > { %1152 = vperm.xlu0 %2831, %v3001_v19  }
  0x4c   : > { %2814 = vset.pattern.permute.xlu1 %v2861_v17 }
  0x4d   : > { %1072 = vperm.xlu1 %2814, %v3001_v19  }
  0x4e   : > { %1156 = vperm.xlu0 %2831, %v3004_v20  }
  0x51   : > { %2815 = vset.pattern.permute.xlu1 %v2858_v2 }
  0x52   : > { %850 = vperm.xlu1 %2815, %v3031_v23   ;;  %1168 = vperm.xlu0 %2831, %v3051_v28  }
  0x56   : > { %2816 = vset.pattern.permute.xlu1 %v2860_v14  ;;  %2840 = vset.pattern.permute.xlu0 %v2863_v24 }
  0x57   : > { %924 = vperm.xlu1 %2816, %v3031_v23   ;;  %1224 = vperm.xlu0 %2840, %v2990_v16  }
  0x5b   : > { %2818 = vset.pattern.permute.xlu1 %v2863_v24  ;;  %1232 = vperm.xlu0 %2840, %v3001_v19  }
  0x5c   : > { %1228 = vperm.xlu1 %2818, %v2980_v10  }
  0x5f   : > { %1240 = vperm.xlu0 %2840, %v3014_v21  }
  0x60   : > { %2819 = vset.pattern.permute.xlu1 %v2859_v5 }
  0x61   : > { %1000 = vperm.xlu1 %2819, %v3014_v21  }
  0x63   : > { %1244 = vperm.xlu0 %2840, %v3031_v23  }
  0x65   : > { %2820 = vset.pattern.permute.xlu1 %v2864_v25 }
  0x66   : > { %1304 = vperm.xlu1 %2820, %v2990_v16  }
  0x67   : > { %1252 = vperm.xlu0 %2840, %v522_v30  }
  0x6a   : > { %2821 = vset.pattern.permute.xlu1 %v2859_v5 }
  0x6b   : > { %1004 = vperm.xlu1 %2821, %v3031_v23   ;;  %2845 = vset.pattern.permute.xlu0 %v2864_v25 }
  0x6c   : > { %1312 = vperm.xlu0 %2845, %v3001_v19  }
  0x6f   : > { %2822 = vset.pattern.permute.xlu1 %v2864_v25 }
  0x70   : > { %1308 = vperm.xlu1 %2822, %v2980_v10   ;;  %1316 = vperm.xlu0 %2845, %v3004_v20  }
  0x74   : > { %2824 = vset.pattern.permute.xlu1 %v2860_v14  ;;  %1324 = vperm.xlu0 %2845, %v3031_v23  }
  0x75   : > { %928 = vperm.xlu1 %2824, %v3051_v28  }
  0x78   : > { %1332 = vperm.xlu0 %2845, %v522_v30  }
  0x79   : > { %2825 = vset.pattern.permute.xlu1 %v2861_v17 }
  0x7a   : > { %1080 = vperm.xlu1 %2825, %v3014_v21  }
  0x7c   : > { %2848 = vset.pattern.permute.xlu0 %v2858_v2 }
  0x7e   : > { %2826 = vset.pattern.permute.xlu1 %v2865_v31 }
  0x7f   : > { %1384 = vperm.xlu1 %2826, %v2990_v16  }
  0x83   : > { %2827 = vset.pattern.permute.xlu1 %v2858_v2 }
  0x84   : > { %860 = vperm.xlu1 %2827, %v522_v30  }
  0x88   : > { %2828 = vset.pattern.permute.xlu1 %v2861_v17 }
  0x89   : > { %1084 = vperm.xlu1 %2828, %v3031_v23  }
  0x8d   : > { %2829 = vset.pattern.permute.xlu1 %v2863_v24 }
  0x8e   : > { %1236 = vperm.xlu1 %2829, %v3004_v20  }
  0x92   : > { %2832 = vset.pattern.permute.xlu1 %v2859_v5 }
  0x93   : > { %1008 = vperm.xlu1 %2832, %v3051_v28  }
  0x96   : > { %v3154_v63 = vpop.permute.xlu1 %830 }
  0x97   : > { %2833 = vset.pattern.permute.xlu1 %v2862_v22  ;;  %4063 = vst [vmem:[#allocation13_spill] sm:$0xff] %v3154_v63  ;;  %v3186_v15 = vpop.permute.xlu0 %988 }
  0x98   : > { %1160 = vperm.xlu1 %2833, %v3014_v21   ;;  %4076 = vst [vmem:[#allocation26_spill] sm:$0xff] %v3186_v15 }
  0x9b   : > { %v3156_v0 = vpop.permute.xlu1 %908 }
  0x9c   : > { %2834 = vset.pattern.permute.xlu1 %v2859_v5  ;;  %4064 = vst [vmem:[#allocation14_spill] sm:$0xff] %v3156_v0 }
  0x9d   : > { %1012 = vperm.xlu1 %2834, %v522_v30  }
  0xa0   : > { %v3158_v1 = vpop.permute.xlu1 %984 }
  0xa1   : > { %2835 = vset.pattern.permute.xlu1 %v2862_v22  ;;  %4065 = vst [vmem:[#allocation15_spill] sm:$0xff] %v3158_v1 }
  0xa2   : > { %1164 = vperm.xlu1 %2835, %v3031_v23  }
  0xa6   : > { %2836 = vset.pattern.permute.xlu1 %v2861_v17 }
  0xa7   : > { %1088 = vperm.xlu1 %2836, %v3051_v28  }
  0xab   : > { %2837 = vset.pattern.permute.xlu1 %v2865_v31 }
  0xac   : > { %1392 = vperm.xlu1 %2837, %v3001_v19  }
  0xb0   : > { %2838 = vset.pattern.permute.xlu1 %v2861_v17  ;;  %v3190_v17 = vpop.permute.xlu0 %1064 }
  0xb1   : > { %1092 = vperm.xlu1 %2838, %v522_v30  }
  0xb4   : > { %v3194_v19 = vpop.permute.xlu0 %1068 }
  0xb5   : > { %2839 = vset.pattern.permute.xlu1 %v2865_v31  ;;  %4078 = vst [vmem:[#allocation28_spill] sm:$0xff] %v3194_v19 }
  0xb6   : > { %1396 = vperm.xlu1 %2839, %v3004_v20  }
  0xba   : > { %2841 = vset.pattern.permute.xlu1 %v2864_v25 }
  0xbb   : > { %1320 = vperm.xlu1 %2841, %v3014_v21  }
  0xbf   : > { %2842 = vset.pattern.permute.xlu1 %v2862_v22 }
  0xc0   : > { %1172 = vperm.xlu1 %2842, %v522_v30  }
  0xc4   : > { %2843 = vset.pattern.permute.xlu1 %v2863_v24 }
  0xc5   : > { %1248 = vperm.xlu1 %2843, %v3051_v28  }
  0xc9   : > { %2844 = vset.pattern.permute.xlu1 %v2865_v31 }
  0xca   : > { %1400 = vperm.xlu1 %2844, %v3014_v21   ;;  %v3198_v21 = vpop.permute.xlu0 %1076 }
  0xcb   : > { %4080 = vst [vmem:[#allocation30_spill] sm:$0xff] %v3198_v21 }
  0xce   : > { %1404 = vperm.xlu1 %2844, %v3031_v23   ;;  %v3202_v23 = vpop.permute.xlu0 %825 }
  0xcf   : > { %4081 = vst [vmem:[#allocation31_spill] sm:$0xff] %v3202_v23 }
  0xd2   : > { %2846 = vset.pattern.permute.xlu1 %v2864_v25  ;;  %v3206_v25 = vpop.permute.xlu0 %845 }
  0xd3   : > { %1328 = vperm.xlu1 %2846, %v3051_v28   ;;  %4083 = vst [vmem:[#allocation33_spill] sm:$0xff] %v3206_v25 }
  0xd6   : > { %v3210_v27 = vpop.permute.xlu0 %855 }
  0xd7   : > { %2847 = vset.pattern.permute.xlu1 %v2865_v31 }
  0xd8   : > { %1408 = vperm.xlu1 %2847, %v3051_v28  }
  0xda   : > { %v3214_v29 = vpop.permute.xlu0 %904 }
  0xdb   : > { %4085 = vst [vmem:[#allocation35_spill] sm:$0xff] %v3214_v29 }
  0xdc   : > { %1412 = vperm.xlu1 %2847, %v522_v30  }
  0xde   : > { %v3218_v31 = vpop.permute.xlu0 %932 }
  0xe0   : > { %2849 = vset.pattern.permute.xlu1 %v2858_v2  ;;  %v3160_v2 = vpop.permute.xlu1 %835 }
  0xe1   : > { %4066 = vst [vmem:[#allocation16_spill] sm:$0xff] %v3160_v2 }
  0xe2   : > { %v3222_v35 = vpop.permute.xlu0 %1388 }
  0xe3   : > { %4088 = vst [vmem:[#allocation38_spill] sm:$0xff] %v3222_v35 }
  0xe4   : > { %v3162_v3 = vpop.permute.xlu1 %912 }
  0xe5   : > { %4067 = vst [vmem:[#allocation17_spill] sm:$0xff] %v3162_v3 }
  0xe8   : > { %v3164_v4 = vpop.permute.xlu1 %840 }
  0xe9   : > { %4068 = vst [vmem:[#allocation18_spill] sm:$0xff] %v3164_v4 }
  0xea   : > { %v2670_v39 = vpop.f32.mrb[0].mxu0 }
  0xeb   : > { %v3122_v40 = vadd.f32 %v2670_v39, %v549_v38  ;;  %v646_v41 = vpop.f32.mrb[1].mxu0 }
  0xec   : > { %v3124_v42 = vadd.f32 %v646_v41, %v549_v38  ;;  %v3166_v5 = vpop.permute.xlu1 %916 }
  0xed   : > { %4055 = vst [vmem:[#allocation5_spill] sm:$0xff] %v3122_v40  ;;  %v686_v45 = vmax.f32 %v3122_v40, 0.0  ;;  %4069 = vst [vmem:[#allocation19_spill] sm:$0xff] %v3166_v5  ;;  %v3285_v40 = vsub.s32 7, %v3109_v33 }
  0xee   : > { %4056 = vst [vmem:[#allocation6_spill] sm:$0xff] %v3124_v42  ;;  %v2673_v43 = vpop.f32.mrb[2].mxu0  ;;  %v685_v44 = vmax.f32 %v3124_v42, 0.0 }
  0xef   : > { %v3128_v46 = vadd.f32 %v2673_v43, %v549_v38  ;;  %v656_v47 = vpop.f32.mrb[3].mxu0 }
  0xf0   : > { %v3130_v48 = vadd.f32 %v656_v47, %v549_v38  ;;  %2688 = vmatprep.mubr.msk.f32.mxu1 %vm693_vm2, %v685_v44  ;;  %v3168_v6 = vpop.permute.xlu1 %992 }
  0xf1   : > { %4057 = vst [vmem:[#allocation7_spill] sm:$0xff] %v3128_v46  ;;  %2689 = vmatmul.mubr.msk.f32.vlgmr.msra.gmra.mrb[0].mxu1 %vm693_vm2, %v686_v45  ;;  %v688_v51 = vmax.f32 %v3128_v46, 0.0 }
  0xf2   : > { %4058 = vst [vmem:[#allocation8_spill] sm:$0xff] %v3130_v48  ;;  %v687_v49 = vmax.f32 %v3130_v48, 0.0  ;;  %v2676_v50 = vpop.f32.mrb[4].mxu0 }
  0xf3   : > { %v3136_v52 = vadd.f32 %v2676_v50, %v549_v38  ;;  %v666_v53 = vpop.f32.mrb[5].mxu0 }
  0xf4   : > { %v3138_v54 = vadd.f32 %v666_v53, %v549_v38  ;;  %2691 = vmatprep.mubr.msk.f32.mxu1 %vm693_vm2, %v687_v49  ;;  %v3170_v7 = vpop.permute.xlu1 %996 }
  0xf5   : > { %4059 = vst [vmem:[#allocation9_spill] sm:$0xff] %v3136_v52  ;;  %2692 = vmatmul.mubr.msk.f32.gmra.mrb[2].mxu1 %vm693_vm2, %v688_v51  ;;  %v690_v57 = vmax.f32 %v3136_v52, 0.0  ;;  %4070 = vst [vmem:[#allocation20_spill] sm:$0xff] %v3170_v7 }
  0xf6   : > { %4060 = vst [vmem:[#allocation10_spill] sm:$0xff] %v3138_v54  ;;  %v689_v55 = vmax.f32 %v3138_v54, 0.0  ;;  %v2679_v56 = vpop.f32.mrb[6].mxu0 }
  0xf7   : > { %v3144_v58 = vadd.f32 %v2679_v56, %v549_v38  ;;  %v676_v59 = vpop.f32.mrb[7].mxu0 }
  0xf8   : > { %v3146_v60 = vadd.f32 %v676_v59, %v549_v38  ;;  %2694 = vmatprep.mubr.msk.f32.mxu1 %vm693_vm2, %v689_v55  ;;  %v3172_v8 = vpop.permute.xlu1 %1148  ;;  %v3226_v38 = vpop.permute.xlu0 %1144  ;;  %v3255_v59 = vsub.s32 1, %v3109_v33 }
  0xf9   : > { %4061 = vst [vmem:[#allocation11_spill] sm:$0xff] %v3144_v58  ;;  %2695 = vmatmul.mubr.msk.f32.gmra.mrb[4].mxu1 %vm693_vm2, %v690_v57  ;;  %v692_v62 = vmax.f32 %v3144_v58, 0.0  ;;  %4071 = vst [vmem:[#allocation21_spill] sm:$0xff] %v3172_v8  ;;  %v3267_v58 = vsub.s32 5, %v3109_v33 }
  0xfa   : > { %4062 = vst [vmem:[#allocation12_spill] sm:$0xff] %v3146_v60  ;;  %v691_v61 = vmax.f32 %v3146_v60, 0.0  ;;  %4089 = vst [vmem:[#allocation39_spill] sm:$0xff] %v3226_v38  ;;  %v3264_v60 = vsub.s32 4, %v3109_v33 }
  0xfb   : > { %4103 = vst [vmem:[#allocation53_spill] sm:$0xff] %v3255_v59 }
  0xfc   : > { %2697 = vmatprep.mubr.msk.f32.mxu1 %vm693_vm2, %v691_v61  ;;  %v3174_v9 = vpop.permute.xlu1 %920  ;;  %v3230_v41 = vpop.permute.xlu0 %1152  ;;  %v3258_v61 = vsub.s32 2, %v3109_v33 }
  0xfd   : > { %2698 = vmatmul.mubr.msk.f32.gmra.mrb[6].mxu1 %vm693_vm2, %v692_v62  ;;  %4072 = vst [vmem:[#allocation22_spill] sm:$0xff] %v3174_v9  ;;  %4091 = vst [vmem:[#allocation41_spill] sm:$0xff] %v3230_v41  ;;  %v3261_v62 = vsub.s32 3, %v3109_v33 }
 0x100   : > { %v3176_v10 = vpop.permute.xlu1 %1072  ;;  %v3234_v44 = vpop.permute.xlu0 %1156 }
 0x101   : > { %4073 = vst [vmem:[#allocation23_spill] sm:$0xff] %v3176_v10  ;;  %4093 = vst [vmem:[#allocation43_spill] sm:$0xff] %v3234_v44 }
 0x104   : > { %v3178_v11 = vpop.permute.xlu1 %850  ;;  %v3238_v47 = vpop.permute.xlu0 %1168 }
 0x105   : > { %4095 = vst [vmem:[#allocation45_spill] sm:$0xff] %v3238_v47 }
 0x108   : > { %v3180_v12 = vpop.permute.xlu1 %924  ;;  %v3242_v50 = vpop.permute.xlu0 %1224 }
 0x109   : > { %4097 = vst [vmem:[#allocation47_spill] sm:$0xff] %v3242_v50 }
 0x10c   : > { %v3182_v13 = vpop.permute.xlu1 %1228  ;;  %v3246_v53 = vpop.permute.xlu0 %1232 }
 0x10d   : > { %4074 = vst [vmem:[#allocation24_spill] sm:$0xff] %v3182_v13  ;;  %4099 = vst [vmem:[#allocation49_spill] sm:$0xff] %v3246_v53 }
 0x110   : > { %v3184_v14 = vpop.permute.xlu1 %1000  ;;  %v3250_v56 = vpop.permute.xlu0 %1240 }
 0x111   : > { %4075 = vst [vmem:[#allocation25_spill] sm:$0xff] %v3184_v14  ;;  %4101 = vst [vmem:[#allocation51_spill] sm:$0xff] %v3250_v56 }
 0x114   : > { %v3188_v16 = vpop.permute.xlu1 %1304  ;;  %v3269_v54 = vpop.permute.xlu0 %1244 }
 0x115   : > { %4077 = vst [vmem:[#allocation27_spill] sm:$0xff] %v3188_v16  ;;  %4104 = vst [vmem:[#allocation54_spill] sm:$0xff] %v3269_v54 }
 0x118   : > { %v3192_v18 = vpop.permute.xlu1 %1004 }
 0x11c   : > { %v3196_v20 = vpop.permute.xlu1 %1308 }
 0x11d   : > { %4079 = vst [vmem:[#allocation29_spill] sm:$0xff] %v3196_v20 }
 0x120   : > { %v3200_v22 = vpop.permute.xlu1 %928 }
 0x124   : > { %v3204_v24 = vpop.permute.xlu1 %1080 }
 0x125   : > { %4082 = vst [vmem:[#allocation32_spill] sm:$0xff] %v3204_v24 }
 0x128   : > { %v3208_v26 = vpop.permute.xlu1 %1384 }
 0x129   : > { %4084 = vst [vmem:[#allocation34_spill] sm:$0xff] %v3208_v26 }
 0x12c   : > { %v3212_v28 = vpop.permute.xlu1 %860 }
 0x130   : > { %v3216_v30 = vpop.permute.xlu1 %1084 }
 0x131   : > { %4086 = vst [vmem:[#allocation36_spill] sm:$0xff] %v3216_v30 }
 0x134   : > { %v3220_v34 = vpop.permute.xlu1 %1236 }
 0x135   : > { %4087 = vst [vmem:[#allocation37_spill] sm:$0xff] %v3220_v34 }
 0x138   : > { %v3224_v36 = vpop.permute.xlu1 %1008 }
 0x13c   : > { %v3228_v39 = vpop.permute.xlu1 %1160 }
 0x13d   : > { %4090 = vst [vmem:[#allocation40_spill] sm:$0xff] %v3228_v39 }
 0x140   : > { %v3232_v43 = vpop.permute.xlu1 %1012 }
 0x141   : > { %4092 = vst [vmem:[#allocation42_spill] sm:$0xff] %v3232_v43 }
 0x144   : > { %v3236_v45 = vpop.permute.xlu1 %1164 }
 0x145   : > { %4094 = vst [vmem:[#allocation44_spill] sm:$0xff] %v3236_v45 }
 0x148   : > { %v3240_v49 = vpop.permute.xlu1 %1088 }
 0x149   : > { %4096 = vst [vmem:[#allocation46_spill] sm:$0xff] %v3240_v49  ;;  %v3274_v49 = vsub.s32 6, %v3109_v33 }
 0x14c   : > { %v3244_v51 = vpop.permute.xlu1 %1392 }
 0x14d   : > { %4098 = vst [vmem:[#allocation48_spill] sm:$0xff] %v3244_v51 }
 0x150   : > { %v3248_v55 = vpop.permute.xlu1 %1092 }
 0x151   : > { %4100 = vst [vmem:[#allocation50_spill] sm:$0xff] %v3248_v55 }
 0x154   : > { %v3252_v57 = vpop.permute.xlu1 %1396 }
 0x155   : > { %4102 = vst [vmem:[#allocation52_spill] sm:$0xff] %v3252_v57 }
 0x158   : > { %v3278_v56 = vpop.permute.xlu1 %1320 }
 0x159   : > { %4105 = vst [vmem:[#allocation55_spill] sm:$0xff] %v3278_v56 }
 0x1c4   : > { %v2690_v32 = vpop.f32.mrb[0].mxu1 }
 0x1c5   : > { %v870_v52 = vrot.slane %v2690_v32, %v3119_v37  ;;  %v942_v47 = vrot.slane %v2690_v32, %v3255_v59  ;;  %v3276_v48 = vpop.f32.mrb[1].mxu1  ;;  %v1022_v39 = vrot.slane %v2690_v32, %v3258_v61  ;;  %v1102_v24 = vrot.slane %v2690_v32, %v3261_v62 }
 0x1c6   : > { %v1182_v26 = vrot.slane %v2690_v32, %v3264_v60  ;;  %v1262_v53 = vrot.slane %v2690_v32, %v3267_v58  ;;  %v1342_v56 = vrot.slane %v2690_v32, %v3274_v49  ;;  %v1422_v33 = vrot.slane %v2690_v32, %v3285_v40 }
 0x1c7   : > { %v896_v42 = vmul.f32 %v870_v52, %v3154_v63  ;;  %v968_v51 = vmul.f32 %v942_v47, %v3156_v0  ;;  %v1048_v52 = vmul.f32 %v1022_v39, %v3186_v15  ;;  %v3295_v63 = vpop.permute.xlu0 %1252  ;;  %v1128_v47 = vmul.f32 %v1102_v24, %v3194_v19  ;;  %v3299_v0 = vpop.permute.xlu1 %1172 }
 0x1c8   : > { %v3289_v16 = vpop.f32.mrb[2].mxu1  ;;  %4106 = vst [vmem:[#allocation56_spill] sm:$0xff] %v3295_v63  ;;  %4107 = vst [vmem:[#allocation57_spill] sm:$0xff] %v3299_v0  ;;  %v1208_v38 = vmul.f32 %v1182_v26, %v3172_v8  ;;  %v1288_v55 = vmul.f32 %v1262_v53, %v3182_v13  ;;  %v3308_v39 = vmul.f32 %v1342_v56, %v3196_v20 }
 0x1c9   : > { %v976_v41 = vadd.f32 %v968_v51, %v896_v42  ;;  %v3292_v50 = vpop.f32.mrb[3].mxu1  ;;  %v866_v42 = vrot.slane %v3276_v48, %v3119_v37  ;;  %v938_v24 = vrot.slane %v3276_v48, %v3255_v59  ;;  %v878_v32 = vrot.slane %v3289_v16, %v3119_v37 }
 0x1ca   : > { %4108 = vst [vmem:[#allocation58_spill] sm:$0xff] %v3308_v39  ;;  %v1018_v53 = vrot.slane %v3276_v48, %v3258_v61  ;;  %v946_v56 = vrot.slane %v3292_v50, %v3255_v59  ;;  %v1030_v20 = vrot.slane %v3289_v16, %v3258_v61  ;;  %v3327_v13 = vmul.f32 %v1422_v33, %v3222_v35 }
 0x1cb   : > { %v1056_v10 = vadd.f32 %v1048_v52, %v976_v41  ;;  %v950_v41 = vrot.slane %v3289_v16, %v3255_v59  ;;  %v874_v52 = vrot.slane %v3292_v50, %v3119_v37  ;;  %v3329_v8 = vpop.permute.xlu0 %1312  ;;  %v898_v19 = vmul.f32 %v878_v32, %v3164_v4 }
 0x1cc   : > { %v3305_v51 = vpop.f32.mrb[4].mxu1  ;;  %4109 = vst [vmem:[#allocation59_spill] sm:$0xff] %v3329_v8  ;;  %v1110_v63 = vrot.slane %v3289_v16, %v3261_v62  ;;  %v3336_v39 = vmul.f32 %v866_v42, %v3202_v23  ;;  %v3345_v8 = vmul.f32 %v938_v24, %v3214_v29  ;;  %v3352_v42 = vpop.permute.xlu1 %1248  ;;  %v3355_v46 = vmul.f32 %v1018_v53, %v3158_v1 }
 0x1cd   : > { %v3316_v26 = vpop.f32.mrb[5].mxu1  ;;  %v970_v15 = vmul.f32 %v950_v41, %v3166_v5  ;;  %v1136_v0 = vadd.f32 %v1128_v47, %v1056_v10  ;;  %v1050_v41 = vmul.f32 %v1030_v20, %v3170_v7  ;;  %v1190_v10 = vrot.slane %v3289_v16, %v3264_v60  ;;  %4110 = vst [vmem:[#allocation60_spill] sm:$0xff] %v3352_v42 }
 0x1ce   : > { %v3358_v33 = vmul.f32 %v874_v52, %v3160_v2  ;;  %v3361_v5 = vmul.f32 %v946_v56, %v3162_v3  ;;  %v1130_v24 = vmul.f32 %v1110_v63, %v3198_v21  ;;  %v1270_v7 = vrot.slane %v3289_v16, %v3267_v58 }
 0x1cf   : > { %v978_v32 = vadd.f32 %v970_v15, %v898_v19  ;;  %v1026_v15 = vrot.slane %v3292_v50, %v3258_v61  ;;  %v1216_v53 = vadd.f32 %v1208_v38, %v1136_v0  ;;  %v1350_v52 = vrot.slane %v3289_v16, %v3274_v49  ;;  %v3378_v19 = vpop.permute.xlu0 %1316 }
 0x1d0   : > { %v3342_v35 = vpop.f32.mrb[6].mxu1  ;;  %v1430_v56 = vrot.slane %v3289_v16, %v3285_v40  ;;  %v886_v3 = vrot.slane %v3305_v51, %v3119_v37  ;;  %4111 = vst [vmem:[#allocation61_spill] sm:$0xff] %v3378_v19  ;;  %v1210_v63 = vmul.f32 %v1190_v10, %v3234_v44  ;;  %v958_v0 = vrot.slane %v3305_v51, %v3255_v59  ;;  %v3395_v44 = vpop.permute.xlu1 %1400 }
 0x1d1   : > { %v3350_v47 = vpop.f32.mrb[7].mxu1  ;;  %v1058_v20 = vadd.f32 %v1050_v41, %v978_v32  ;;  %v882_v38 = vrot.slane %v3316_v26, %v3119_v37  ;;  %v954_v16 = vrot.slane %v3316_v26, %v3255_v59  ;;  %v1034_v41 = vrot.slane %v3316_v26, %v3258_v61 }
 0x1d2   : > { %v900_v21 = vmul.f32 %v886_v3, %v3178_v11  ;;  %v3391_v2 = vmul.f32 %v1026_v15, %v3168_v6  ;;  %v1290_v10 = vmul.f32 %v1270_v7, %v3220_v34  ;;  %v1296_v4 = vadd.f32 %v1288_v55, %v1216_v53 }
 0x1d3   : > { %v1138_v32 = vadd.f32 %v1130_v24, %v1058_v20  ;;  %v972_v24 = vmul.f32 %v958_v0, %v3180_v12  ;;  %v1370_v1 = vmul.f32 %v1350_v52, %v3378_v19  ;;  %v1450_v29 = vmul.f32 %v1430_v56, %v3252_v57 }
 0x1d4   : > { %v1038_v23 = vrot.slane %v3305_v51, %v3258_v61  ;;  %v1118_v7 = vrot.slane %v3305_v51, %v3261_v62  ;;  %v3411_v55 = vmul.f32 %v954_v16, %v3174_v9  ;;  %v3414_v53 = vmul.f32 %v1034_v41, %v3184_v14 }
 0x1d5   : > { %v1218_v20 = vadd.f32 %v1210_v63, %v1138_v32  ;;  %v3408_v32 = vmul.f32 %v882_v38, %v3206_v25  ;;  %v980_v52 = vadd.f32 %v972_v24, %v900_v21  ;;  %v1198_v56 = vrot.slane %v3305_v51, %v3264_v60 }
 0x1d6   : > { %v1278_v63 = vrot.slane %v3305_v51, %v3267_v58  ;;  %v1358_v0 = vrot.slane %v3305_v51, %v3274_v49  ;;  %v1438_v38 = vrot.slane %v3305_v51, %v3285_v40  ;;  %v1052_v16 = vmul.f32 %v1038_v23, %v3192_v18  ;;  %v3438_v51 = vpop.permute.xlu1 %1404 }
 0x1d7   : > { %v1298_v42 = vadd.f32 %v1290_v10, %v1218_v20  ;;  %v3424_v10 = vpop.permute.xlu0 %1324  ;;  %v894_v21 = vrot.slane %v3342_v35, %v3119_v37  ;;  %v966_v41 = vrot.slane %v3342_v35, %v3255_v59  ;;  %v1132_v24 = vmul.f32 %v1118_v7, %v3216_v30  ;;  %4113 = vst [vmem:[#allocation63_spill] sm:$0xff] %v3438_v51 }
 0x1d8   : > { %4112 = vst [vmem:[#allocation62_spill] sm:$0xff] %v3424_v10  ;;  %v890_v15 = vrot.slane %v3350_v47, %v3119_v37  ;;  %v962_v3 = vrot.slane %v3350_v47, %v3255_v59  ;;  %v1060_v23 = vadd.f32 %v1052_v16, %v980_v52  ;;  %v1212_v7 = vmul.f32 %v1198_v56, %v3236_v45  ;;  %v4118_v16 = vld [vmem:[#allocation39_spill] sm:$0xff] }
 0x1d9   : > { %v1378_v20 = vadd.f32 %v1370_v1, %v1298_v42  ;;  %v1046_v1 = vrot.slane %v3342_v35, %v3258_v61  ;;  %v1042_v42 = vrot.slane %v3350_v47, %v3258_v61  ;;  %v902_v57 = vmul.f32 %v894_v21, %v3212_v28 }
 0x1da   : > { %v974_v19 = vmul.f32 %v966_v41, %v3218_v31  ;;  %v1292_v30 = vmul.f32 %v1278_v63, %v3269_v54  ;;  %v1372_v34 = vmul.f32 %v1358_v0, %v3424_v10  ;;  %v3448_v14 = vmul.f32 %v1438_v38, %v3438_v51  ;;  %v3500_v10 = vpop.permute.xlu1 %1328  ;;  %v4128_v54 = vld [vmem:[#allocation27_spill] sm:$0xff] }
 0x1db   : > { %v1458_v9 = vadd.f32 %v1450_v29, %v1378_v20  ;;  %v3455_v21 = vmul.f32 %v890_v15, %v3210_v27  ;;  %v1054_v56 = vmul.f32 %v1046_v1, %v3232_v43  ;;  %v1126_v63 = vrot.slane %v3342_v35, %v3261_v62 }
 0x1dc   : > { %v982_v25 = vadd.f32 %v974_v19, %v902_v57  ;;  %v975_v0 = vadd.f32 %v3345_v8, %v3336_v39  ;;  %v1140_v38 = vadd.f32 %v1132_v24, %v1060_v23  ;;  %v973_v29 = vmul.f32 %v962_v3, %v3200_v22  ;;  %v4115_v39 = vld [vmem:[#allocation7_spill] sm:$0xff]  ;;  %v4116_v23 = vld [vmem:[#allocation58_spill] sm:$0xff] }
 0x1dd   : > { %v3464_v20 = vmul.f32 %v1042_v42, %v3224_v36  ;;  %v1206_v57 = vrot.slane %v3342_v35, %v3264_v60  ;;  %v4114_v41 = vrot.slane %v3276_v48, %v3261_v62  ;;  %v1258_v8 = vrot.slane %v3276_v48, %v3267_v58  ;;  %4123 = vst [vmem:[#allocation58_spill] sm:$0xff] %v3500_v10 }
 0x1de   : > { %v1062_v19 = vadd.f32 %v1054_v56, %v982_v25  ;;  %v1055_v15 = vadd.f32 %v3355_v46, %v975_v0  ;;  %v3476_v24 = vadd.f32 %v1458_v9, %v4115_v39  ;;  %v1286_v3 = vrot.slane %v3342_v35, %v3267_v58  ;;  %v4117_v46 = vld [vmem:[#allocation50_spill] sm:$0xff] }
 0x1df   : > { %v1127_v1 = vmul.f32 %v4114_v41, %v3190_v17  ;;  %v1376_v42 = vadd.f32 %v4116_v23, %v1296_v4  ;;  %v977_v25 = vadd.f32 %v3361_v5, %v3358_v33  ;;  %v1134_v56 = vmul.f32 %v1126_v63, %v4117_v46  ;;  %v4120_v23 = vld [vmem:[#allocation23_spill] sm:$0xff] }
 0x1e0   : > { %v4119_v41 = vrot.slane %v3276_v48, %v3264_v60  ;;  %v1338_v9 = vrot.slane %v3276_v48, %v3274_v49  ;;  %v1220_v43 = vadd.f32 %v1212_v7, %v1140_v38  ;;  %v1418_v51 = vrot.slane %v3276_v48, %v3285_v40  ;;  %v4124_v48 = vld [vmem:[#allocation41_spill] sm:$0xff] }
 0x1e1   : > { %v1135_v0 = vadd.f32 %v1127_v1, %v1055_v15  ;;  %v1057_v4 = vadd.f32 %v3391_v2, %v977_v25  ;;  %v4121_v5 = vrot.slane %v3292_v50, %v3261_v62  ;;  %v1142_v63 = vadd.f32 %v1134_v56, %v1062_v19  ;;  %v4122_v1 = vld [vmem:[#allocation47_spill] sm:$0xff]  ;;  %v4126_v19 = vld [vmem:[#allocation57_spill] sm:$0xff]  ;;  %v4127_v56 = vld [vmem:[#allocation56_spill] sm:$0xff] }
 0x1e2   : > { %v1207_v52 = vmul.f32 %v4119_v41, %v4118_v16  ;;  %v1287_v46 = vmul.f32 %v1258_v8, %v4122_v1  ;;  %v1266_v41 = vrot.slane %v3292_v50, %v3267_v58  ;;  %v1456_v7 = vadd.f32 %v3327_v13, %v1376_v42 }
 0x1e3   : > { %v1129_v33 = vmul.f32 %v4121_v5, %v4120_v23  ;;  %v4125_v2 = vrot.slane %v3292_v50, %v3264_v60  ;;  %v1346_v5 = vrot.slane %v3292_v50, %v3274_v49  ;;  %v1294_v8 = vmul.f32 %v1286_v3, %v4127_v56  ;;  %v4129_v23 = vld [vmem:[#allocation49_spill] sm:$0xff] }
 0x1e4   : > { %v1215_v15 = vadd.f32 %v1207_v52, %v1135_v0  ;;  %v1214_v52 = vmul.f32 %v1206_v57, %v4126_v19  ;;  %v1367_v45 = vmul.f32 %v1338_v9, %v4128_v54  ;;  %v1300_v39 = vadd.f32 %v1292_v30, %v1220_v43  ;;  %v4132_v30 = vld [vmem:[#allocation59_spill] sm:$0xff] }
 0x1e5   : > { %v1137_v38 = vadd.f32 %v1129_v33, %v1057_v4  ;;  %v1209_v25 = vmul.f32 %v4125_v2, %v4124_v48  ;;  %v1289_v13 = vmul.f32 %v1266_v41, %v4129_v23  ;;  %v1426_v42 = vrot.slane %v3292_v50, %v3285_v40  ;;  %v4130_v2 = vld [vmem:[#allocation34_spill] sm:$0xff] }
 0x1e6   : > { %v1295_v0 = vadd.f32 %v1287_v46, %v1215_v15  ;;  %v1366_v4 = vrot.slane %v3342_v35, %v3274_v49  ;;  %v1447_v48 = vmul.f32 %v1418_v51, %v4130_v2  ;;  %v979_v57 = vadd.f32 %v3411_v55, %v3408_v32  ;;  %v4131_v46 = vld [vmem:[#allocation5_spill] sm:$0xff] }
 0x1e7   : > { %v1217_v1 = vadd.f32 %v1209_v25, %v1137_v38  ;;  %v1222_v3 = vadd.f32 %v1214_v52, %v1142_v63  ;;  %v1464_v15 = vadd.f32 %v1456_v7, %v4131_v46  ;;  %v1369_v43 = vmul.f32 %v1346_v5, %v4132_v30  ;;  %v4133_v25 = vld [vmem:[#allocation32_spill] sm:$0xff]  ;;  %v4137_v7 = vld [vmem:[#allocation6_spill] sm:$0xff] }
 0x1e8   : > { %v1375_v33 = vadd.f32 %v1367_v45, %v1295_v0  ;;  %v1059_v41 = vadd.f32 %v3414_v53, %v979_v57  ;;  %v4134_v50 = vrot.slane %v3316_v26, %v3261_v62  ;;  %v1274_v45 = vrot.slane %v3316_v26, %v3267_v58  ;;  %v3529_v0 = vpop.permute.xlu1 %1408  ;;  %v4136_v63 = vld [vmem:[#allocation48_spill] sm:$0xff] }
 0x1e9   : > { %v1297_v9 = vadd.f32 %v1289_v13, %v1217_v1  ;;  %v1380_v51 = vadd.f32 %v1372_v34, %v1300_v39  ;;  %4135 = vst [vmem:[#allocation39_spill] sm:$0xff] %v3529_v0  ;;  %v1446_v32 = vrot.slane %v3342_v35, %v3285_v40  ;;  %v1449_v1 = vmul.f32 %v1426_v42, %v4136_v63  ;;  %v4138_v5 = vld [vmem:[#allocation40_spill] sm:$0xff]  ;;  %v3541_v34 = vpop.permute.xlu0 %1332 }
 0x1ea   : > { %v1455_v38 = vadd.f32 %v1447_v48, %v1375_v33  ;;  %v1131_v56 = vmul.f32 %v4134_v50, %v4133_v25  ;;  %v4139_v52 = vrot.slane %v3316_v26, %v3264_v60  ;;  %v1354_v33 = vrot.slane %v3316_v26, %v3274_v49  ;;  %4140 = vst [vmem:[#allocation27_spill] sm:$0xff] %v3541_v34 }
 0x1eb   : > { %v1377_v55 = vadd.f32 %v1369_v43, %v1297_v9  ;;  %v1302_v39 = vadd.f32 %v1294_v8, %v1222_v3  ;;  %v1472_v57 = vmax.f32 %v1464_v15, 0.0  ;;  %v981_v35 = vadd.f32 %v973_v29, %v3455_v21  ;;  %v4141_v43 = vld [vmem:[#allocation51_spill] sm:$0xff] }
 0x1ec   : > { %v1463_v48 = vadd.f32 %v1455_v38, %v4137_v7  ;;  %v1139_v53 = vadd.f32 %v1131_v56, %v1059_v41  ;;  %v1211_v13 = vmul.f32 %v4139_v52, %v4138_v5  ;;  %v1291_v38 = vmul.f32 %v1274_v45, %v4141_v43  ;;  %v4142_v41 = vld [vmem:[#allocation8_spill] sm:$0xff]  ;;  %v4143_v5 = vld [vmem:[#allocation46_spill] sm:$0xff] }
 0x1ed   : > { %v1457_v50 = vadd.f32 %v1449_v1, %v1377_v55  ;;  %v1434_v56 = vrot.slane %v3316_v26, %v3285_v40  ;;  %v1061_v52 = vadd.f32 %v3464_v20, %v981_v35  ;;  %v4144_v25 = vrot.slane %v3350_v47, %v3261_v62  ;;  %v4145_v26 = vld [vmem:[#allocation55_spill] sm:$0xff]  ;;  %v3559_v55 = vpop.permute.xlu1 %1412 }
 0x1ee   : > { %v1471_v9 = vmax.f32 %v1463_v48, 0.0  ;;  %v1219_v42 = vadd.f32 %v1211_v13, %v1139_v53  ;;  %v1282_v3 = vrot.slane %v3350_v47, %v3267_v58  ;;  %v1460_v21 = vadd.f32 %v3448_v14, %v1380_v51  ;;  %4146 = vst [vmem:[#allocation49_spill] sm:$0xff] %v3559_v55  ;;  %v4147_v48 = vld [vmem:[#allocation45_spill] sm:$0xff] }
 0x1ef   : > { %v1465_v19 = vadd.f32 %v1457_v50, %v4142_v41  ;;  %v1133_v8 = vmul.f32 %v4144_v25, %v4143_v5  ;;  %v1374_v29 = vmul.f32 %v1366_v4, %v3541_v34  ;;  %v1371_v45 = vmul.f32 %v1354_v33, %v4145_v26 }
 0x1f0   : > { %2708 = vmatprep.mubr.msk.f32.mxu0 %vm693_vm2, %v1471_v9  ;;  %v1299_v15 = vadd.f32 %v1291_v38, %v1219_v42  ;;  %v4148_v25 = vrot.slane %v3350_v47, %v3264_v60  ;;  %v1362_v14 = vrot.slane %v3350_v47, %v3274_v49  ;;  %v1451_v13 = vmul.f32 %v1434_v56, %v3395_v44  ;;  %v4150_v38 = vld [vmem:[#allocation9_spill] sm:$0xff] }
 0x1f1   : > { %2709 = vmatmul.mubr.msk.f32.vlgmr.msra.gmra.mrb[8].mxu0 %vm693_vm2, %v1472_v57  ;;  %v1473_v20 = vmax.f32 %v1465_v19, 0.0  ;;  %v1141_v1 = vadd.f32 %v1133_v8, %v1061_v52  ;;  %v1382_v4 = vadd.f32 %v1374_v29, %v1302_v39  ;;  %v1474_v33 = vmax.f32 %v3476_v24, 0.0  ;;  %v4149_v57 = vld [vmem:[#allocation60_spill] sm:$0xff]  ;;  %v4151_v29 = vld [vmem:[#allocation10_spill] sm:$0xff] }
 0x1f2   : > { %v1213_v53 = vmul.f32 %v4148_v25, %v4147_v48  ;;  %v1379_v51 = vadd.f32 %v1371_v45, %v1299_v15  ;;  %v1293_v19 = vmul.f32 %v1282_v3, %v4149_v57  ;;  %v1442_v35 = vrot.slane %v3350_v47, %v3285_v40  ;;  %v4152_v47 = vld [vmem:[#allocation11_spill] sm:$0xff] }
 0x1f3   : > { %2711 = vmatprep.mubr.msk.f32.mxu0 %vm693_vm2, %v1473_v20  ;;  %v1454_v9 = vmul.f32 %v1446_v32, %v3559_v55  ;;  %v1468_v52 = vadd.f32 %v1460_v21, %v4150_v38  ;;  %v1373_v56 = vmul.f32 %v1362_v14, %v3500_v10  ;;  %v4153_v32 = vld [vmem:[#allocation12_spill] sm:$0xff]  ;;  %v536_v14 = vld [vmem:[%s3974_s9] sm:$0xff] }
 0x1f4   : > { %v1221_v50 = vadd.f32 %v1213_v53, %v1141_v1  ;;  %v1459_v42 = vadd.f32 %v1451_v13, %v1379_v51  ;;  %v1453_v45 = vmul.f32 %v1442_v35, %v3529_v0  ;;  %v538_v13 = vld [vmem:[%s3974_s9 + $0x10] sm:$0xff]  ;;  %v531_v35 = vld [vmem:[%s3972_s7] sm:$0xff] }
 0x1f5   : > { %2712 = vmatmul.mubr.msk.f32.gmra.mrb[10].mxu0 %vm693_vm2, %v1474_v33  ;;  %v1462_v8 = vadd.f32 %v1454_v9, %v1382_v4  ;;  %v1476_v20 = vmax.f32 %v1468_v52, 0.0  ;;  %v537_v4 = vld [vmem:[%s3974_s9 + $0x8] sm:$0xff] }
 0x1f6   : > { %v1301_v39 = vadd.f32 %v1293_v19, %v1221_v50  ;;  %v1467_v15 = vadd.f32 %v1459_v42, %v4151_v29  ;;  %v2773_v33 = vpack.c.bf16 %v537_v4, %v536_v14  ;;  %v539_v50 = vld [vmem:[%s3974_s9 + $0x18] sm:$0xff]  ;;  %v532_v9 = vld [vmem:[%s3972_s7 + $0x8] sm:$0xff]  ;;  %v2866_v42 = vmov 0.0|0.0  }
 0x1f7   : > { %v1470_v25 = vadd.f32 %v1462_v8, %v4152_v47  ;;  %v2777_v19 = vpack.c.bf16 %v539_v50, %v538_v13  ;;  %2767 = vmatprep.subr.bf16.mxu0 %v2866_v42  ;;  %v2768_v52 = vpack.c.bf16 %v532_v9, %v531_v35  ;;  %v4154_v4 = vld [vmem:[#allocation13_spill] sm:$0xff]  ;;  %v4157_v9 = vld [vmem:[#allocation28_spill] sm:$0xff] }
 0x1f8   : > { %v1381_v24 = vadd.f32 %v1373_v56, %v1301_v39  ;;  %v1475_v3 = vmax.f32 %v1467_v15, 0.0  ;;  %2774 = vmatprep.subr.bf16.mxu1 %v2773_v33  ;;  %v533_v39 = vld [vmem:[%s3972_s7 + $0x10] sm:$0xff]  ;;  %v534_v56 = vld [vmem:[%s3972_s7 + $0x18] sm:$0xff]  ;;  %v2868_v15 = vmov 0.0  }
 0x1f9   : > { %v1478_v51 = vmax.f32 %v1470_v25, 0.0  ;;  %2776 = vmatpush3.bf16.msra.mxu1 %v2773_v33  ;;  %2769 = vmatpush3.bf16.msra.mxu0 %v2768_v52  ;;  %v2771_v8 = vpack.c.bf16 %v534_v56, %v533_v39  ;;  %v4155_v33 = vld [vmem:[#allocation14_spill] sm:$0xff]  ;;  %v4158_v52 = vld [vmem:[#allocation21_spill] sm:$0xff]  ;;  %v4159_v56 = vld [vmem:[#allocation24_spill] sm:$0xff] }
 0x1fa   : > { %v1461_v1 = vadd.f32 %v1453_v45, %v1381_v24  ;;  %2714 = vmatprep.mubr.msk.f32.mxu0 %vm693_vm2, %v1475_v3  ;;  %2778 = vmatprep.subr.bf16.mxu1 %v2777_v19 }
 0x1fb   : > { %2715 = vmatmul.mubr.msk.f32.gmra.mrb[12].mxu0 %vm693_vm2, %v1476_v20  ;;  %2770 = vmatprep.subr.bf16.mxu0 %v2866_v42 }
 0x1fc   : > { %v1469_v21 = vadd.f32 %v1461_v1, %v4153_v32  ;;  %v4166_v32 = vld [vmem:[#allocation19_spill] sm:$0xff] }
 0x1fd   : > { %2780 = vmatpush3.bf16.msra.mxu1 %v2777_v19  ;;  %2772 = vmatpush3.bf16.msra.mxu0 %v2771_v8  ;;  %v4156_v19 = vld [vmem:[#allocation26_spill] sm:$0xff] }
 0x1fe   : > { %v1477_v53 = vmax.f32 %v1469_v21, 0.0 }
 0x200   : > { %2717 = vmatprep.mubr.msk.f32.mxu0 %vm693_vm2, %v1477_v53 }
 0x201   : > { %2718 = vmatmul.mubr.msk.f32.gmra.mrb[14].mxu0 %vm693_vm2, %v1478_v51 }
 0x202   : > { %2728 = vmatprep.mubr.msk.f32.mxu0 %vm2867_vm3, %v2868_v15  ;;  %v4160_v15 = vld [vmem:[#allocation29_spill] sm:$0xff] }
 0x2c4   : > { %v2710_v24 = vpop.f32.mrb[8].mxu0 }
 0x2c5   : > { %v1615_v45 = vrot.slane %v2710_v24, %v3119_v37  ;;  %v1655_v3 = vrot.slane %v2710_v24, %v3255_v59  ;;  %v1703_v20 = vrot.slane %v2710_v24, %v3258_v61  ;;  %v1751_v1 = vrot.slane %v2710_v24, %v3261_v62  ;;  %v3614_v25 = vpop.f32.mrb[9].mxu0 }
 0x2c6   : > { %v1799_v21 = vrot.slane %v2710_v24, %v3264_v60  ;;  %v1847_v53 = vrot.slane %v2710_v24, %v3267_v58  ;;  %v1895_v51 = vrot.slane %v2710_v24, %v3274_v49  ;;  %v1943_v14 = vrot.slane %v2710_v24, %v3285_v40 }
 0x2c7   : > { %v1641_v13 = vmul.f32 %v1615_v45, %v4154_v4  ;;  %v1681_v50 = vmul.f32 %v1655_v3, %v4155_v33  ;;  %v1729_v35 = vmul.f32 %v1703_v20, %v4156_v19  ;;  %v1777_v42 = vmul.f32 %v1751_v1, %v4157_v9  ;;  %v4161_v1 = vld [vmem:[#allocation38_spill] sm:$0xff]  ;;  %v4162_v33 = vld [vmem:[#allocation31_spill] sm:$0xff] }
 0x2c8   : > { %v1825_v39 = vmul.f32 %v1799_v21, %v4158_v52  ;;  %v1873_v8 = vmul.f32 %v1847_v53, %v4159_v56  ;;  %v3627_v47 = vmul.f32 %v1895_v51, %v4160_v15  ;;  %v3629_v55 = vpop.f32.mrb[10].mxu0  ;;  %v1611_v24 = vrot.slane %v3614_v25, %v3119_v37  ;;  %v4163_v19 = vld [vmem:[#allocation35_spill] sm:$0xff]  ;;  %v4165_v15 = vld [vmem:[#allocation18_spill] sm:$0xff] }
 0x2c9   : > { %v1689_v34 = vadd.f32 %v1681_v50, %v1641_v13  ;;  %v1651_v45 = vrot.slane %v3614_v25, %v3255_v59  ;;  %v1699_v3 = vrot.slane %v3614_v25, %v3258_v61  ;;  %v3637_v20 = vpop.f32.mrb[11].mxu0  ;;  %v3640_v21 = vmul.f32 %v1943_v14, %v4161_v1  ;;  %v4164_v56 = vld [vmem:[#allocation15_spill] sm:$0xff] }
 0x2ca   : > { %v1747_v53 = vrot.slane %v3614_v25, %v3261_v62  ;;  %v1623_v51 = vrot.slane %v3629_v55, %v3119_v37  ;;  %v1663_v4 = vrot.slane %v3629_v55, %v3255_v59  ;;  %v1640_v50 = vmul.f32 %v1611_v24, %v4162_v33  ;;  %v4168_v33 = vld [vmem:[#allocation16_spill] sm:$0xff] }
 0x2cb   : > { %v1737_v13 = vadd.f32 %v1729_v35, %v1689_v34  ;;  %v1680_v9 = vmul.f32 %v1651_v45, %v4163_v19  ;;  %v1795_v52 = vrot.slane %v3614_v25, %v3264_v60  ;;  %v1728_v14 = vmul.f32 %v1699_v3, %v4164_v56  ;;  %v4167_v45 = vld [vmem:[#allocation20_spill] sm:$0xff] }
 0x2cc   : > { %v3654_v1 = vmul.f32 %v1623_v51, %v4165_v15  ;;  %v3657_v0 = vmul.f32 %v1663_v4, %v4166_v32  ;;  %v1711_v10 = vrot.slane %v3629_v55, %v3258_v61  ;;  %v1619_v35 = vrot.slane %v3637_v20, %v3119_v37 }
 0x2cd   : > { %v1785_v38 = vadd.f32 %v1777_v42, %v1737_v13  ;;  %v1659_v24 = vrot.slane %v3637_v20, %v3255_v59  ;;  %v1707_v51 = vrot.slane %v3637_v20, %v3258_v61  ;;  %v1755_v42 = vrot.slane %v3637_v20, %v3261_v62 }
 0x2ce   : > { %v3668_v3 = vmul.f32 %v1711_v10, %v4167_v45  ;;  %v3676_v4 = vpop.f32.mrb[12].mxu0  ;;  %v1642_v19 = vmul.f32 %v1619_v35, %v4168_v33  ;;  %v1803_v56 = vrot.slane %v3637_v20, %v3264_v60  ;;  %v4169_v45 = vld [vmem:[#allocation17_spill] sm:$0xff] }
 0x2cf   : > { %v1833_v13 = vadd.f32 %v1825_v39, %v1785_v38  ;;  %v1631_v10 = vrot.slane %v3676_v4, %v3119_v37  ;;  %v3683_v15 = vpop.f32.mrb[13].mxu0  ;;  %v1682_v32 = vmul.f32 %v1659_v24, %v4169_v45  ;;  %v1730_v34 = vmul.f32 %v1707_v51, %v3168_v6  ;;  %v4172_v6 = vld [vmem:[#allocation22_spill] sm:$0xff] }
 0x2d0   : > { %v1671_v57 = vrot.slane %v3676_v4, %v3255_v59  ;;  %v1719_v38 = vrot.slane %v3676_v4, %v3258_v61  ;;  %v1627_v48 = vrot.slane %v3683_v15, %v3119_v37  ;;  %v1667_v51 = vrot.slane %v3683_v15, %v3255_v59 }
 0x2d1   : > { %v1881_v39 = vadd.f32 %v1873_v8, %v1833_v13  ;;  %v3692_v35 = vmul.f32 %v1631_v10, %v3178_v11  ;;  %v1715_v8 = vrot.slane %v3683_v15, %v3258_v61  ;;  %v4171_v13 = vld [vmem:[#allocation33_spill] sm:$0xff] }
 0x2d2   : > { %v3699_v24 = vmul.f32 %v1671_v57, %v3180_v12  ;;  %v3708_v11 = vmul.f32 %v1719_v38, %v3192_v18  ;;  %v1644_v10 = vmul.f32 %v1627_v48, %v4171_v13  ;;  %v1684_v33 = vmul.f32 %v1667_v51, %v4172_v6  ;;  %v4173_v48 = vld [vmem:[#allocation25_spill] sm:$0xff] }
 0x2d3   : > { %v1688_v38 = vadd.f32 %v1680_v9, %v1640_v50  ;;  %v1732_v13 = vmul.f32 %v1715_v8, %v4173_v48 }
 0x2d4   : > { %4170 = vst [vmem:[#allocation34_spill] sm:$0xff] %v3708_v11  ;;  %v3715_v57 = vpop.f32.mrb[14].mxu0 }
 0x2d5   : > { %v1639_v5 = vrot.slane %v3715_v57, %v3119_v37  ;;  %v1679_v29 = vrot.slane %v3715_v57, %v3255_v59  ;;  %v3722_v18 = vpop.f32.mrb[15].mxu0  ;;  %v1736_v45 = vadd.f32 %v1728_v14, %v1688_v38  ;;  %v4176_v14 = vld [vmem:[#allocation47_spill] sm:$0xff] }
 0x2d6   : > { %v1635_v6 = vrot.slane %v3722_v18, %v3119_v37  ;;  %v1675_v50 = vrot.slane %v3722_v18, %v3255_v59  ;;  %v1723_v9 = vrot.slane %v3722_v18, %v3258_v61  ;;  %v1776_v37 = vmul.f32 %v1747_v53, %v3190_v17  ;;  %v4177_v53 = vld [vmem:[#allocation41_spill] sm:$0xff] }
 0x2d7   : > { %v3732_v51 = vmul.f32 %v1639_v5, %v3212_v28  ;;  %v3741_v8 = vmul.f32 %v1679_v29, %v3218_v31  ;;  %v1824_v31 = vmul.f32 %v1795_v52, %v4118_v16  ;;  %v1891_v29 = vrot.slane %v3614_v25, %v3274_v49 }
 0x2d8   : > { %v3744_v48 = vmul.f32 %v1635_v6, %v3210_v27  ;;  %v3751_v5 = vmul.f32 %v1675_v50, %v3200_v22  ;;  %v3754_v11 = vmul.f32 %v1723_v9, %v3224_v36  ;;  %v1843_v27 = vrot.slane %v3614_v25, %v3267_v58  ;;  %v4175_v36 = vld [vmem:[#allocation23_spill] sm:$0xff] }
 0x2d9   : > { %4174 = vst [vmem:[#allocation5_spill] sm:$0xff] %v3741_v8  ;;  %v1939_v6 = vrot.slane %v3614_v25, %v3285_v40  ;;  %v1784_v28 = vadd.f32 %v1776_v37, %v1736_v45  ;;  %v1929_v22 = vadd.f32 %v3627_v47, %v1881_v39  ;;  %v1690_v50 = vadd.f32 %v1682_v32, %v1642_v19  ;;  %v4178_v32 = vld [vmem:[#allocation30_spill] sm:$0xff] }
 0x2da   : > { %v1778_v9 = vmul.f32 %v1755_v42, %v4175_v36  ;;  %v1872_v38 = vmul.f32 %v1843_v27, %v4176_v14  ;;  %v1920_v17 = vmul.f32 %v1891_v29, %v4128_v54  ;;  %v1826_v52 = vmul.f32 %v1803_v56, %v4177_v53 }
 0x2db   : > { %v1968_v16 = vmul.f32 %v1939_v6, %v4130_v2  ;;  %v1832_v12 = vadd.f32 %v1824_v31, %v1784_v28  ;;  %v1977_v59 = vadd.f32 %v3640_v21, %v1929_v22  ;;  %v1738_v8 = vadd.f32 %v1730_v34, %v1690_v50  ;;  %v4180_v28 = vld [vmem:[#allocation43_spill] sm:$0xff]  ;;  %v4182_v6 = vld [vmem:[#allocation37_spill] sm:$0xff] }
 0x2dc   : > { %v1851_v37 = vrot.slane %v3637_v20, %v3267_v58  ;;  %v1899_v47 = vrot.slane %v3637_v20, %v3274_v49  ;;  %v1947_v25 = vrot.slane %v3637_v20, %v3285_v40  ;;  %v1691_v54 = vadd.f32 %v3657_v0, %v3654_v1 }
 0x2dd   : > { %v4179_v2 = vrot.slane %v3629_v55, %v3261_v62  ;;  %v1880_v19 = vadd.f32 %v1872_v38, %v1832_v12  ;;  %v1985_v21 = vadd.f32 %v1977_v59, %v4131_v46  ;;  %v1786_v34 = vadd.f32 %v1778_v9, %v1738_v8  ;;  %v4183_v9 = vld [vmem:[#allocation61_spill] sm:$0xff]  ;;  %v4184_v38 = vld [vmem:[#allocation52_spill] sm:$0xff] }
 0x2de   : > { %v1874_v56 = vmul.f32 %v1851_v37, %v4129_v23  ;;  %v1922_v39 = vmul.f32 %v1899_v47, %v4132_v30  ;;  %v1970_v45 = vmul.f32 %v1947_v25, %v4136_v63  ;;  %v1739_v20 = vadd.f32 %v3668_v3, %v1691_v54  ;;  %v4185_v47 = vld [vmem:[#allocation32_spill] sm:$0xff] }
 0x2df   : > { %v1779_v42 = vmul.f32 %v4179_v2, %v4178_v32  ;;  %v4181_v0 = vrot.slane %v3629_v55, %v3264_v60  ;;  %v1928_v31 = vadd.f32 %v1920_v17, %v1880_v19  ;;  %v1993_v27 = vmax.f32 %v1985_v21, 0.0  ;;  %v4187_v25 = vld [vmem:[#allocation40_spill] sm:$0xff] }
 0x2e0   : > { %v1834_v29 = vadd.f32 %v1826_v52, %v1786_v34  ;;  %v1855_v59 = vrot.slane %v3629_v55, %v3267_v58  ;;  %v1903_v23 = vrot.slane %v3629_v55, %v3274_v49  ;;  %v1951_v30 = vrot.slane %v3629_v55, %v3285_v40 }
 0x2e1   : > { %v1827_v1 = vmul.f32 %v4181_v0, %v4180_v28  ;;  %v1787_v46 = vadd.f32 %v1779_v42, %v1739_v20  ;;  %v1692_v63 = vadd.f32 %v1684_v33, %v1644_v10  ;;  %v1976_v3 = vadd.f32 %v1968_v16, %v1928_v31 }
 0x2e2   : > { %v2007_v12 = vsel %vm693_vm2, %v1993_v27, 0.0  ;;  %v1882_v8 = vadd.f32 %v1874_v56, %v1834_v29  ;;  %v1875_v22 = vmul.f32 %v1855_v59, %v4182_v6  ;;  %v1923_v14 = vmul.f32 %v1903_v23, %v4183_v9  ;;  %v4189_v23 = vld [vmem:[#allocation36_spill] sm:$0xff] }
 0x2e3   : > { %v2008_v50 = vrot.slane %v2007_v12, 4  ;;  %v1835_v36 = vadd.f32 %v1827_v1, %v1787_v46  ;;  %v1971_v17 = vmul.f32 %v1951_v30, %v4184_v38  ;;  %v1984_v53 = vadd.f32 %v1976_v3, %v4137_v7  ;;  %v4191_v3 = vld [vmem:[#allocation7_spill] sm:$0xff] }
 0x2e4   : > { %v1930_v52 = vadd.f32 %v1922_v39, %v1882_v8  ;;  %v1740_v37 = vadd.f32 %v1732_v13, %v1692_v63  ;;  %v4186_v55 = vrot.slane %v3683_v15, %v3261_v62  ;;  %v4188_v54 = vrot.slane %v3683_v15, %v3264_v60  ;;  %v4192_v8 = vld [vmem:[#allocation44_spill] sm:$0xff] }
 0x2e5   : > { %v2009_v10 = vadd.f32 %v2008_v50, %v2007_v12  ;;  %v1883_v16 = vadd.f32 %v1875_v22, %v1835_v36  ;;  %v1859_v2 = vrot.slane %v3683_v15, %v3267_v58  ;;  %v1992_v42 = vmax.f32 %v1984_v53, 0.0 }
 0x2e6   : > { %v1780_v33 = vmul.f32 %v4186_v55, %v4185_v47  ;;  %v1828_v32 = vmul.f32 %v4188_v54, %v4187_v25  ;;  %v1978_v19 = vadd.f32 %v1970_v45, %v1930_v52  ;;  %v1907_v13 = vrot.slane %v3683_v15, %v3274_v49  ;;  %v4195_v52 = vld [vmem:[#allocation54_spill] sm:$0xff] }
 0x2e7   : > { %v2010_v21 = vrot.slane %v2009_v10, 2  ;;  %v1931_v34 = vadd.f32 %v1923_v14, %v1883_v16  ;;  %v1876_v56 = vmul.f32 %v1859_v2, %v4141_v43  ;;  %v1955_v39 = vrot.slane %v3683_v15, %v3285_v40  ;;  %2739 = vmatprep.mubr.msk.f32.mxu1 %vm693_vm2, %v1992_v42  ;;  %v4196_v54 = vld [vmem:[#allocation10_spill] sm:$0xff] }
 0x2e8   : > { %v1788_v7 = vadd.f32 %v1780_v33, %v1740_v37  ;;  %v2000_v20 = vsel %vm693_vm2, %v1992_v42, 0.0  ;;  %v1986_v28 = vadd.f32 %v1978_v19, %v4142_v41  ;;  %v1924_v45 = vmul.f32 %v1907_v13, %v4145_v26  ;;  %2740 = vmatmul.mubr.msk.f32.vlgmr.msra.gmra.mrb[8].mxu1 %vm693_vm2, %v1993_v27  ;;  %v4197_v42 = vld [vmem:[#allocation62_spill] sm:$0xff] }
 0x2e9   : > { %v2001_v1 = vrot.slane %v2000_v20, 4  ;;  %v2011_v31 = vadd.f32 %v2010_v21, %v2009_v10  ;;  %v1979_v29 = vadd.f32 %v1971_v17, %v1931_v34  ;;  %v1972_v59 = vmul.f32 %v1955_v39, %v3395_v44  ;;  %v4198_v21 = vld [vmem:[#allocation63_spill] sm:$0xff] }
 0x2ea   : > { %v1836_v0 = vadd.f32 %v1828_v32, %v1788_v7  ;;  %v1994_v43 = vmax.f32 %v1986_v28, 0.0  ;;  %v1693_v15 = vadd.f32 %v3699_v24, %v3692_v35  ;;  %v4190_v41 = vrot.slane %v3676_v4, %v3261_v62  ;;  %v4194_v35 = vld [vmem:[#allocation34_spill] sm:$0xff] }
 0x2eb   : > { %v2002_v63 = vadd.f32 %v2001_v1, %v2000_v20  ;;  %v2012_v26 = vrot.slane %v2011_v31, 1  ;;  %v1987_v12 = vadd.f32 %v1979_v29, %v4191_v3  ;;  %v4193_v27 = vrot.slane %v3676_v4, %v3264_v60 }
 0x2ec   : > { %v1884_v46 = vadd.f32 %v1876_v56, %v1836_v0  ;;  %v1781_v30 = vmul.f32 %v4190_v41, %v4189_v23  ;;  %v2014_v6 = vsel %vm693_vm2, %v1994_v43, 0.0  ;;  %2742 = vmatprep.mubr.msk.f32.mxu1 %vm693_vm2, %v1994_v43  ;;  %v1741_v24 = vadd.f32 %v4194_v35, %v1693_v15  ;;  %v4199_v0 = vld [vmem:[#allocation46_spill] sm:$0xff] }
 0x2ed   : > { %v1829_v44 = vmul.f32 %v4193_v27, %v4192_v8  ;;  %v1863_v50 = vrot.slane %v3676_v4, %v3267_v58  ;;  %v2003_v36 = vrot.slane %v2002_v63, 2  ;;  %v2013_v9 = vadd.f32 %v2012_v26, %v2011_v31 }
 0x2ee   : > { %v1932_v22 = vadd.f32 %v1924_v45, %v1884_v46  ;;  %v2015_v14 = vrot.slane %v2014_v6, 4  ;;  %v1995_v38 = vmax.f32 %v1987_v12, 0.0  ;;  %v1789_v53 = vadd.f32 %v1781_v30, %v1741_v24  ;;  %v4203_v12 = vld [vmem:[#allocation60_spill] sm:$0xff]  ;;  %v4204_v24 = vld [vmem:[#allocation42_spill] sm:$0xff] }
 0x2ef   : > { %v1877_v37 = vmul.f32 %v1863_v50, %v4195_v52  ;;  %v1911_v47 = vrot.slane %v3676_v4, %v3274_v49  ;;  %v2004_v55 = vadd.f32 %v2003_v36, %v2002_v63  ;;  %v1959_v16 = vrot.slane %v3676_v4, %v3285_v40 }
 0x2f0   : > { %v1980_v17 = vadd.f32 %v1972_v59, %v1932_v22  ;;  %v2016_v33 = vadd.f32 %v2015_v14, %v2014_v6  ;;  %v2021_v10 = vsel %vm693_vm2, %v1995_v38, 0.0  ;;  %2743 = vmatmul.mubr.msk.f32.gmra.mrb[10].mxu1 %vm693_vm2, %v1995_v38  ;;  %v1837_v2 = vadd.f32 %v1829_v44, %v1789_v53  ;;  %v4201_v59 = vld [vmem:[#allocation45_spill] sm:$0xff] }
 0x2f1   : > { %v2022_v25 = vrot.slane %v2021_v10, 4  ;;  %v1925_v19 = vmul.f32 %v1911_v47, %v4197_v42  ;;  %v2005_v7 = vrot.slane %v2004_v55, 1  ;;  %v1973_v34 = vmul.f32 %v1959_v16, %v4198_v21  ;;  %v4206_v14 = vld [vmem:[#allocation9_spill] sm:$0xff]  ;;  %v4209_v16 = vld [vmem:[#allocation39_spill] sm:$0xff] }
 0x2f2   : > { %v1988_v32 = vadd.f32 %v1980_v17, %v4196_v54  ;;  %v2017_v13 = vrot.slane %v2016_v33, 2  ;;  %v1694_v56 = vadd.f32 %v3751_v5, %v3744_v48  ;;  %v1885_v28 = vadd.f32 %v1877_v37, %v1837_v2  ;;  %v4207_v17 = vld [vmem:[#allocation5_spill] sm:$0xff]  ;;  %v4210_v54 = vld [vmem:[#allocation50_spill] sm:$0xff] }
 0x2f3   : > { %v2023_v39 = vadd.f32 %v2022_v25, %v2021_v10  ;;  %v4200_v4 = vrot.slane %v3722_v18, %v3261_v62  ;;  %v2006_v1 = vadd.f32 %v2005_v7, %v2004_v55  ;;  %v4202_v43 = vrot.slane %v3722_v18, %v3264_v60  ;;  %v4208_v55 = vld [vmem:[#allocation58_spill] sm:$0xff] }
 0x2f4   : > { %v1996_v20 = vmax.f32 %v1988_v32, 0.0  ;;  %v2018_v31 = vadd.f32 %v2017_v13, %v2016_v33  ;;  %v1742_v29 = vadd.f32 %v3754_v11, %v1694_v56  ;;  %v1933_v5 = vadd.f32 %v1925_v19, %v1885_v28 }
 0x2f5   : > { %v1782_v45 = vmul.f32 %v4200_v4, %v4199_v0  ;;  %v1830_v46 = vmul.f32 %v4202_v43, %v4201_v59  ;;  %v2024_v15 = vrot.slane %v2023_v39, 2  ;;  %v1867_v23 = vrot.slane %v3722_v18, %v3267_v58 }
 0x2f6   : > { %v2028_v48 = vsel %vm693_vm2, %v1996_v20, 0.0  ;;  %2745 = vmatprep.mubr.msk.f32.mxu1 %vm693_vm2, %v1996_v20  ;;  %v2019_v41 = vrot.slane %v2018_v31, 1  ;;  %v2071_v30 = vsel %vm2070_vm4, %v2013_v9, %v2006_v1  ;;  %v1981_v3 = vadd.f32 %v1973_v34, %v1933_v5  ;;  %v4212_v34 = vld [vmem:[#allocation57_spill] sm:$0xff]  ;;  %v4214_v1 = vld [vmem:[#allocation56_spill] sm:$0xff] }
 0x2f7   : > { %v2029_v63 = vrot.slane %v2028_v48, 4  ;;  %v1790_v11 = vadd.f32 %v1782_v45, %v1742_v29  ;;  %v2025_v26 = vadd.f32 %v2024_v15, %v2023_v39  ;;  %v1878_v8 = vmul.f32 %v1867_v23, %v4203_v12  ;;  %v4215_v15 = vld [vmem:[#allocation12_spill] sm:$0xff]  ;;  %v4216_v23 = vld [vmem:[#allocation27_spill] sm:$0xff] }
 0x2f8   : > { %v1915_v27 = vrot.slane %v3722_v18, %v3274_v49  ;;  %v2020_v44 = vadd.f32 %v2019_v41, %v2018_v31  ;;  %v1963_v35 = vrot.slane %v3722_v18, %v3285_v40  ;;  %v4205_v50 = vrot.slane %v3715_v57, %v3258_v61 }
 0x2f9   : > { %v2030_v6 = vadd.f32 %v2029_v63, %v2028_v48  ;;  %v1838_v22 = vadd.f32 %v1830_v46, %v1790_v11  ;;  %v2026_v9 = vrot.slane %v2025_v26, 1  ;;  %v1989_v38 = vadd.f32 %v1981_v3, %v4206_v14  ;;  %v4217_v3 = vld [vmem:[#allocation49_spill] sm:$0xff] }
 0x2fa   : > { %v1735_v36 = vmul.f32 %v4205_v50, %v4204_v24  ;;  %v1695_v53 = vadd.f32 %v4207_v17, %v3732_v51  ;;  %v2073_v52 = vsel %vm2072_vm5, %v2020_v44, %v2071_v30  ;;  %v1926_v33 = vmul.f32 %v1915_v27, %v4208_v55 }
 0x2fb   : > { %v2031_v37 = vrot.slane %v2030_v6, 2  ;;  %v1886_v47 = vadd.f32 %v1878_v8, %v1838_v22  ;;  %v1997_v10 = vmax.f32 %v1989_v38, 0.0  ;;  %v1974_v18 = vmul.f32 %v1963_v35, %v4209_v16  ;;  %v4218_v35 = vld [vmem:[#allocation11_spill] sm:$0xff] }
 0x2fc   : > { %v1743_v25 = vadd.f32 %v1735_v36, %v1695_v53  ;;  %v4211_v32 = vrot.slane %v3715_v57, %v3261_v62  ;;  %v2027_v42 = vadd.f32 %v2026_v9, %v2025_v26  ;;  %v1871_v51 = vrot.slane %v3715_v57, %v3267_v58 }
 0x2fd   : > { %v2032_v19 = vadd.f32 %v2031_v37, %v2030_v6  ;;  %v1934_v7 = vadd.f32 %v1926_v33, %v1886_v47  ;;  %v2035_v13 = vsel %vm693_vm2, %v1997_v10, 0.0  ;;  %2746 = vmatmul.mubr.msk.f32.gmra.mrb[12].mxu1 %vm693_vm2, %v1997_v10  ;;  %v4213_v56 = vrot.slane %v3715_v57, %v3264_v60 }
 0x2fe   : > { %v1783_v2 = vmul.f32 %v4211_v32, %v4210_v54  ;;  %v1919_v20 = vrot.slane %v3715_v57, %v3274_v49  ;;  %v2036_v0 = vrot.slane %v2035_v13, 4  ;;  %v1879_v31 = vmul.f32 %v1871_v51, %v4214_v1  ;;  %v543_v54 = vld [vmem:[#allocation2] sm:$0x1] }
 0x2ff   : > { %v1831_v39 = vmul.f32 %v4213_v56, %v4212_v34  ;;  %v2033_v28 = vrot.slane %v2032_v19, 1  ;;  %v1982_v4 = vadd.f32 %v1974_v18, %v1934_v7  ;;  %v1967_v29 = vrot.slane %v3715_v57, %v3285_v40  ;;  %2781 = vpush %v543_v54  ;;  %v2603_v32 = vld [vmem:[%s3975_s10] ss:$0 sm:$0xff] }
 0x300   : > { %v1791_v21 = vadd.f32 %v1783_v2, %v1743_v25  ;;  %v2075_v59 = vsel %vm2074_vm6, %v2027_v42, %v2073_v52  ;;  %v2037_v46 = vadd.f32 %v2036_v0, %v2035_v13  ;;  %v1927_v41 = vmul.f32 %v1919_v20, %v4216_v23  ;;  %v2613_v51 = vld [vmem:[%s3977_s12] ss:$0 sm:$0xff] }
 0x301   : > { %v2034_v43 = vadd.f32 %v2033_v28, %v2032_v19  ;;  %v1990_v48 = vadd.f32 %v1982_v4, %v4215_v15  ;;  %v1975_v12 = vmul.f32 %v1967_v29, %v4217_v3 }
 0x302   : > { %v1839_v45 = vadd.f32 %v1831_v39, %v1791_v21  ;;  %v2038_v30 = vrot.slane %v2037_v46, 2 }
 0x303   : > { %v1998_v63 = vmax.f32 %v1990_v48, 0.0  ;;  %v2077_v11 = vsel %vm2076_vm7, %v2034_v43, %v2075_v59 }
 0x304   : > { %v1887_v5 = vadd.f32 %v1879_v31, %v1839_v45  ;;  %v2039_v8 = vadd.f32 %v2038_v30, %v2037_v46 }
 0x305   : > { %v2042_v27 = vsel %vm693_vm2, %v1998_v63, 0.0  ;;  %2748 = vmatprep.mubr.msk.f32.mxu1 %vm693_vm2, %v1998_v63 }
 0x306   : > { %v1935_v26 = vadd.f32 %v1927_v41, %v1887_v5  ;;  %v2043_v57 = vrot.slane %v2042_v27, 4  ;;  %v2040_v6 = vrot.slane %v2039_v8, 1 }
 0x308   : > { %v1983_v44 = vadd.f32 %v1975_v12, %v1935_v26  ;;  %v2044_v22 = vadd.f32 %v2043_v57, %v2042_v27  ;;  %v2041_v50 = vadd.f32 %v2040_v6, %v2039_v8  ;;  %v2601_v27 = vld [vmem:[%s3973_s8] ss:$0 sm:$0xff] }
 0x30a   : > { %v1991_v24 = vadd.f32 %v1983_v44, %v4218_v35  ;;  %v2045_v36 = vrot.slane %v2044_v22, 2  ;;  %v2079_v14 = vsel %vm2078_vm8, %v2041_v50, %v2077_v11  ;;  %v2612_v35 = vld [vmem:[%s3976_s11] ss:$0 sm:$0xff] }
 0x30c   : > { %v1999_v9 = vmax.f32 %v1991_v24, 0.0  ;;  %v2046_v38 = vadd.f32 %v2045_v36, %v2044_v22 }
 0x30e   : > { %v2049_v17 = vsel %vm693_vm2, %v1999_v9, 0.0  ;;  %2749 = vmatmul.mubr.msk.f32.gmra.mrb[14].mxu1 %vm693_vm2, %v1999_v9  ;;  %v2047_v52 = vrot.slane %v2046_v38, 1 }
 0x30f   : > { %v2050_v53 = vrot.slane %v2049_v17, 4 }
 0x310   : > { %v2048_v47 = vadd.f32 %v2047_v52, %v2046_v38 }
 0x311   : > { %v2051_v37 = vadd.f32 %v2050_v53, %v2049_v17 }
 0x312   : > { %v2081_v33 = vsel %vm2080_vm9, %v2048_v47, %v2079_v14 }
 0x313   : > { %v2052_v55 = vrot.slane %v2051_v37, 2 }
 0x315   : > { %v2053_v10 = vadd.f32 %v2052_v55, %v2051_v37 }
 0x317   : > { %v2054_v16 = vrot.slane %v2053_v10, 1 }
 0x319   : > { %v2055_v18 = vadd.f32 %v2054_v16, %v2053_v10  ;;  %v4219_v10 = vld [vmem:[#allocation53_spill] sm:$0xff] }
 0x31b   : > { %v2083_v25 = vsel %vm2082_vm10, %v2055_v18, %v2081_v33  ;;  %v4220_v18 = vld [vmem:[#allocation4_spill] sm:$0xff] }
 0x31c   : > { %2729 = vmatmul.mubr.msk.f32.vlgmr.msra.gmra.mrb[16].mxu0 %vm693_vm2, %v2083_v25 }
 0x330   : > { %s2782_s18 = spop %2781 }
 0x3bb   : > { %v2741_v2 = vpop.f32.mrb[8].mxu1 }
 0x3bc   : > { %v2259_v42 = vadd.f32 %v2741_v2, %v2603_v32  ;;  %v2253_v19 = vpop.f32.mrb[9].mxu1 }
 0x3bd   : > { %v2254_v7 = vadd.f32 %v2603_v32, %v2253_v19 }
 0x3be   : > { %v2293_v13 = vmax.f32 %v2259_v42, 0.0 }
 0x3bf   : > { %v2292_v21 = vmax.f32 %v2254_v7, 0.0 }
 0x3c0   : > { %v2317_v34 = vmul.f32 %v2613_v51, %v2293_v13 }
 0x3c1   : > { %v2316_v39 = vmul.f32 %v2613_v51, %v2292_v21 }
 0x3c2   : > { %v2327_v0 = vsel %vm693_vm2, %v2317_v34, 0.0 }
 0x3c3   : > { %v2744_v56 = vpop.f32.mrb[10].mxu1  ;;  %2328 = vadd.xlane.f32.xlu0 %v2327_v0  ;;  %v2324_v45 = vsel %vm693_vm2, %v2316_v39, 0.0 }
 0x3c4   : > { %v2269_v20 = vadd.f32 %v2744_v56, %v2603_v32  ;;  %v2263_v28 = vpop.f32.mrb[11].mxu1  ;;  %2325 = vadd.xlane.f32.xlu1 %v2324_v45 }
 0x3c5   : > { %v2264_v4 = vadd.f32 %v2603_v32, %v2263_v28 }
 0x3c6   : > { %v2295_v1 = vmax.f32 %v2269_v20, 0.0 }
 0x3c7   : > { %v2294_v31 = vmax.f32 %v2264_v4, 0.0 }
 0x3c8   : > { %v2319_v29 = vmul.f32 %v2613_v51, %v2295_v1 }
 0x3c9   : > { %v2318_v59 = vmul.f32 %v2613_v51, %v2294_v31 }
 0x3ca   : > { %v2333_v43 = vsel %vm693_vm2, %v2319_v29, 0.0 }
 0x3cb   : > { %v2330_v46 = vsel %vm693_vm2, %v2318_v59, 0.0  ;;  %2334 = vadd.xlane.f32.xlu1 %v2333_v43 }
 0x3cc   : > { %2331 = vadd.xlane.f32.xlu0 %v2330_v46 }
 0x3d0   : > { %v2747_v15 = vpop.f32.mrb[12].mxu1 }
 0x3d1   : > { %v2279_v48 = vadd.f32 %v2747_v15, %v2603_v32  ;;  %v2273_v5 = vpop.f32.mrb[13].mxu1 }
 0x3d2   : > { %v2274_v57 = vadd.f32 %v2603_v32, %v2273_v5 }
 0x3d3   : > { %v2297_v23 = vmax.f32 %v2279_v48, 0.0 }
 0x3d4   : > { %v2296_v24 = vmax.f32 %v2274_v57, 0.0 }
 0x3d5   : > { %v2321_v41 = vmul.f32 %v2613_v51, %v2297_v23 }
 0x3d6   : > { %v2320_v17 = vmul.f32 %v2613_v51, %v2296_v24 }
 0x3d7   : > { %v2339_v30 = vsel %vm693_vm2, %v2321_v41, 0.0 }
 0x3d8   : > { %2340 = vadd.xlane.f32.xlu1 %v2339_v30  ;;  %v2336_v53 = vsel %vm693_vm2, %v2320_v17, 0.0  ;;  %v4221_v30 = vlaneseq }
 0x3e1   : > { %v2750_v63 = vpop.f32.mrb[14].mxu1 }
 0x3e2   : > { %v2289_v11 = vadd.f32 %v2750_v63, %v2603_v32  ;;  %v2283_v26 = vpop.f32.mrb[15].mxu1  ;;  %v2441_v63 = vand.u32 127, %v4221_v30 }
 0x3e3   : > { %v2284_v50 = vadd.f32 %v2603_v32, %v2283_v26  ;;  %v2398_v32 = vstv %s2782_s18 }
 0x3e4   : > { %v2299_v3 = vmax.f32 %v2289_v11, 0.0  ;;  %v4222_v11 = vld [vmem:[#allocation3_spill] sm:$0xff] }
 0x3e5   : > { %v2298_v14 = vmax.f32 %v2284_v50, 0.0  ;;  %v2444_v26 = vsub.s32 %v2441_v63, %v4222_v11 }
 0x3e6   : > { %v2323_v12 = vmul.f32 %v2613_v51, %v2299_v3 }
 0x3e7   : > { %v2322_v52 = vmul.f32 %v2613_v51, %v2298_v14 }
 0x3e8   : > { %v2345_v8 = vsel %vm693_vm2, %v2323_v12, 0.0 }
 0x3e9   : > { %2346 = vadd.xlane.f32.xlu1 %v2345_v8  ;;  %v2342_v37 = vsel %vm693_vm2, %v2322_v52, 0.0 }
 0x3ef   : > { %v2152_v44 = vpop.f32.mrb[16].mxu0 }
 0x3f0   : > { %v2153_v6 = vadd.f32 %v2601_v27, %v2152_v44  ;;  %v2730_v22 = vpop.f32.mrb[17].mxu0 }
 0x3f2   : > { %v2156_v36 = vmax.f32 %v2153_v6, 0.0 }
 0x3f4   : > { %v2306_v9 = vmul.f32 %v2612_v35, %v2156_v36  ;;  %v523_v36 = vld [vmem:[%s503_s21] sm:$0xff] }
 0x3f5   : > { %vm2407_vm11 = vcmp.ne.f32.partialorder %v523_v36, 0.0 }
 0x3f6   : > { %v2307_v38 = vsel %vm693_vm2, %v2306_v9, 0.0 }
 0x3f7   : > { %2308 = vadd.xlane.f32.xlu0 %v2307_v38 }
 0x3fb   : > { %2337 = vadd.xlane.f32.xlu0 %v2336_v53 }
 0x3ff   : > { %2343 = vadd.xlane.f32.xlu0 %v2342_v37 }
 0x450   : > { %v2329_v47 = vpop.xlane.xlu0 %2328 }
 0x451   : > { %v2326_v54 = vpop.xlane.xlu1 %2325 }
 0x458   : > { %v2335_v34 = vpop.xlane.xlu1 %2334 }
 0x459   : > { %v2332_v55 = vpop.xlane.xlu0 %2331 }
 0x465   : > { %v2341_v45 = vpop.xlane.xlu1 %2340 }
 0x484   : > { %v2309_v33 = vpop.xlane.xlu0 %2308 }
 0x485   : > { %v2356_v16 = vrot.slane %v2309_v33, %v4219_v10  ;;  %v2352_v25 = vrot.slane %v2309_v33, %v4220_v18  ;;  %v2360_v2 = vrot.slane %v2309_v33, %v3258_v61  ;;  %v2364_v21 = vrot.slane %v2309_v33, %v3261_v62 }
 0x486   : > { %v2368_v28 = vrot.slane %v2309_v33, %v3264_v60  ;;  %v2372_v61 = vrot.slane %v2309_v33, %v3267_v58  ;;  %v2376_v62 = vrot.slane %v2309_v33, %v3274_v49  ;;  %v2380_v46 = vrot.slane %v2309_v33, %v3285_v40  ;;  %v2347_v60 = vpop.xlane.xlu1 %2346 }
 0x487   : > { %v2390_v42 = vadd.f32 %v2356_v16, %v2329_v47  ;;  %v2389_v19 = vadd.f32 %v2352_v25, %v2326_v54  ;;  %v2391_v13 = vadd.f32 %v2360_v2, %v2332_v55  ;;  %v2392_v39 = vadd.f32 %v2364_v21, %v2335_v34 }
 0x488   : > { %v2338_v20 = vpop.xlane.xlu0 %2337  ;;  %v2394_v31 = vadd.f32 %v2372_v61, %v2341_v45  ;;  %v2396_v48 = vadd.f32 %v2380_v46, %v2347_v60 }
 0x489   : > { %v2400_v7 = vadd.f32 %v2398_v32, %v2390_v42  ;;  %v2399_v51 = vadd.f32 %v2398_v32, %v2389_v19  ;;  %v2401_v56 = vadd.f32 %v2398_v32, %v2391_v13  ;;  %v2393_v0 = vadd.f32 %v2368_v28, %v2338_v20 }
 0x48a   : > { %v2402_v4 = vadd.f32 %v2398_v32, %v2392_v39  ;;  %v2404_v43 = vadd.f32 %v2398_v32, %v2394_v31  ;;  %v2406_v58 = vadd.f32 %v2398_v32, %v2396_v48 }
 0x48b   : > { %2420 = vperm.xlu1 %2849, %v2400_v7   ;;  %2417 = vperm.xlu0 %2848, %v2399_v51   ;;  %v2403_v1 = vadd.f32 %v2398_v32, %v2393_v0 }
 0x48c   : > { %v2344_v29 = vpop.xlane.xlu0 %2343 }
 0x48d   : > { %v2395_v59 = vadd.f32 %v2376_v62, %v2344_v29 }
 0x48f   : > { %2423 = vperm.xlu1 %2849, %v2401_v56   ;;  %v2405_v15 = vadd.f32 %v2398_v32, %v2395_v59 }
 0x493   : > { %2426 = vperm.xlu1 %2849, %v2402_v4  }
 0x497   : > { %2429 = vperm.xlu1 %2849, %v2403_v1  }
 0x49b   : > { %2432 = vperm.xlu1 %2849, %v2404_v43  }
 0x49f   : > { %2435 = vperm.xlu1 %2849, %v2405_v15  }
 0x4a3   : > { %2438 = vperm.xlu1 %2849, %v2406_v58  }
 0x50a   : > { %v2421_v5 = vpop.permute.xlu1 %2420  ;;  %v2418_v40 = vpop.permute.xlu0 %2417 }
 0x50b   : > { %v2449_v12 = vrot.slane %v2421_v5, %v2444_v26  ;;  %v2445_v8 = vrot.slane %v2418_v40, %v2444_v26 }
 0x50d   : > { %v2474_v22 = vsel %vm2070_vm4, %v2449_v12, %v2445_v8 }
 0x50e   : > { %v2424_v23 = vpop.permute.xlu1 %2423 }
 0x50f   : > { %v2453_v27 = vrot.slane %v2424_v23, %v2444_v26 }
 0x511   : > { %v2475_v24 = vsel %vm2072_vm5, %v2453_v27, %v2474_v22 }
 0x512   : > { %v2427_v41 = vpop.permute.xlu1 %2426 }
 0x513   : > { %v2457_v57 = vrot.slane %v2427_v41, %v2444_v26 }
 0x515   : > { %v2476_v9 = vsel %vm2074_vm6, %v2457_v57, %v2475_v24 }
 0x516   : > { %v2430_v49 = vpop.permute.xlu1 %2429 }
 0x517   : > { %v2461_v44 = vrot.slane %v2430_v49, %v2444_v26 }
 0x519   : > { %v2477_v14 = vsel %vm2076_vm7, %v2461_v44, %v2476_v9 }
 0x51a   : > { %v2433_v3 = vpop.permute.xlu1 %2432 }
 0x51b   : > { %v2465_v35 = vrot.slane %v2433_v3, %v2444_v26 }
 0x51d   : > { %v2478_v17 = vsel %vm2078_vm8, %v2465_v35, %v2477_v14 }
 0x51e   : > { %v2436_v6 = vpop.permute.xlu1 %2435 }
 0x51f   : > { %v2469_v50 = vrot.slane %v2436_v6, %v2444_v26 }
 0x521   : > { %v2479_v52 = vsel %vm2080_vm9, %v2469_v50, %v2478_v17 }
 0x522   : > { %v2439_v38 = vpop.permute.xlu1 %2438 }
 0x523   : > { %v2473_v53 = vrot.slane %v2439_v38, %v2444_v26 }
 0x525   : > { %v2480_v37 = vsel %vm2082_vm10, %v2473_v53, %v2479_v52 }
 0x526   : > { %v2482_v47 = vsel %vm2407_vm11, %v2480_v37, -1e+12 }
 0x527   : > { %v2484_v55 = vsel %vm2483_vm12, %v2482_v47, -inf }
 0x528   : > { %2485 = vmax.xlane.f32.xlu1 %v2484_v55 }
 0x5b5   : > { %v2486_v33 = vpop.xlane.xlu1 %2485 }
 0x5b6   : > { %v2491_v10 = vrot.slane %v2486_v33, %v2444_v26 }
 0x5b8   : > { %2494 = vst.msk [vmem:[%s506_s24] sm:$0x1] %vm2493_vm13, %v2491_v10 }
 0x5b9 PF: > { %s26_s15 = sadd.s32 1, %s2856_s15  }
 0x5ba   : > { %p23_p5 = scmp.ge.s32.totalorder %s26_s15, 5  }
 0x5bc   :  { %25 = sbr.rel (!%p23_p5) target bundleno = 3 (0x3), region = 112 }

</bundles_post_ra>
